<compile_context>
chip_gen: v5e
topology: v5e:2x2
jax: 0.10.0
libtpu: 0.0.40
codegen_flags: <defaults>
</compile_context>

<pallas_src>
import functools

import numpy as np
import jax
import jax.numpy as jnp
from jax.experimental import pallas as pl
from jax.experimental.pallas import tpu as pltpu

# Synthetic stand-ins for the dataset vocabularies referenced in task.py.
allowable_features = {'possible_atomic_num_list': list(range(16))}
allowable_features_index = {'possible_atomic_num_list': 0}

NUM_NODE_FEATS = 4
EMBED_DIM = 32
HIDDEN_DIMS = (64, len(allowable_features['possible_atomic_num_list']))  # last == num_classes
NUM_CLASSES = HIDDEN_DIMS[-1]
TASK_FEATURE_IDX = allowable_features_index['possible_atomic_num_list']
MASK_RATE = 0.3

TILE_M = 128   # masked-row tile: multiple of 8 (f32) and 16 (bf16) sublanes; bump to 256 on v6e/v7x.
LANE = 128     # lane-dense output width (unmasked vst).


# ----------------------------- fused Pallas kernel ---------------------------
def _fused_task_kernel(nvalid_ref,            # scalar prefetch (SMEM): [1] int32 valid-row count
                       xm_ref,                # [TILE_M, F] int32 gathered masked-row features
                       wenc_ref, benc_ref,    # f32 stand-in encoder params
                       w1_ref, b1_ref,        # bf16 weight / f32 bias
                       w2_ref, b2_ref,        # bf16 weight / f32 bias
                       out_ref):              # [1, 8, LANE] f32 per-tile CE partial sum
    tile = pl.program_id(0)
    rows = xm_ref[...]                                            # int32 [TILE_M, F]

    # labels = x[mask, task_feature_idx]  (read BEFORE zeroing)
    labels = rows[:, TASK_FEATURE_IDX:TASK_FEATURE_IDX + 1]       # int32 [TILE_M, 1]

    # data['ligand'].x[mask] = 0 : every row handled here IS a masked row, so
    # its backbone input features are zeroed in-kernel (no extra HBM pass).
    feats = rows.astype(jnp.float32) * 0.0                        # f32 [TILE_M, F]

    # ---- stand-in backbone: per-node Linear(F->E) + tanh ---------------------
    # TODO(synk): `self.model` is an externally injected (message-passing) GNN;
    # a real backbone needs ALL nodes, so this masked-rows-only encode is only
    # valid for the per-node stand-in used here.
    # K = NUM_NODE_FEATS = 4 would underfill every MXU generation, so the
    # encoder is 4 VPU broadcast-FMAs instead of a jnp.dot.
    h = jnp.broadcast_to(benc_ref[...], (TILE_M, EMBED_DIM))
    for f in range(NUM_NODE_FEATS):
        h = h + feats[:, f:f + 1] * wenc_ref[f:f + 1, :]
    emb = jnp.tanh(h)                                             # f32 [TILE_M, E]

    # ---- MultiLayerPerceptron: Linear -> ReLU -> Linear (bf16 MXU, f32 acc) --
    h1 = jnp.dot(emb.astype(jnp.bfloat16), w1_ref[...],
                 preferred_element_type=jnp.float32) + b1_ref[...]
    h1 = jnp.maximum(h1, 0.0)
    logits = jnp.dot(h1.astype(jnp.bfloat16), w2_ref[...],
                     preferred_element_type=jnp.float32) + b2_ref[...]

    # ---- CrossEntropyLoss: numerically-stable log-softmax, sum over valid rows
    mx = jnp.max(logits, axis=-1, keepdims=True)
    lse = mx + jnp.log(jnp.sum(jnp.exp(logits - mx), axis=-1, keepdims=True))
    cls = jax.lax.broadcasted_iota(jnp.int32, logits.shape, 1)
    picked = jnp.sum(jnp.where(cls == labels, logits, 0.0), axis=-1, keepdims=True)
    per_row = lse - picked                                        # f32 [TILE_M, 1] (vreg only)

    row_ids = jax.lax.broadcasted_iota(jnp.int32, per_row.shape, 0) + tile * TILE_M
    tile_sum = jnp.sum(jnp.where(row_ids < nvalid_ref[0], per_row, 0.0))

    # lane-dense (8,128) store of this tile's partial sum.
    out_ref[...] = jnp.full((1, 8, LANE), tile_sum, dtype=jnp.float32)


@functools.partial(jax.jit, static_argnames=("num_tiles",))
def _task_step(x, mask_pad, nvalid, w_enc, b_enc, w1, b1, w2, b2, *, num_tiles):
    # Gather ONLY the masked rows; label extraction + zeroing happen in-kernel.
    xm = jnp.take(x, mask_pad, axis=0).astype(jnp.int32)          # [M_pad, F]

    grid_spec = pltpu.PrefetchScalarGridSpec(
        num_scalar_prefetch=1,
        grid=(num_tiles,),
        in_specs=[
            pl.BlockSpec((TILE_M, NUM_NODE_FEATS), lambda i, nv: (i, 0)),
            pl.BlockSpec((NUM_NODE_FEATS, EMBED_DIM), lambda i, nv: (0, 0)),
            pl.BlockSpec((1, EMBED_DIM), lambda i, nv: (0, 0)),
            pl.BlockSpec((EMBED_DIM, HIDDEN_DIMS[0]), lambda i, nv: (0, 0)),
            pl.BlockSpec((1, HIDDEN_DIMS[0]), lambda i, nv: (0, 0)),
            pl.BlockSpec((HIDDEN_DIMS[0], NUM_CLASSES), lambda i, nv: (0, 0)),
            pl.BlockSpec((1, NUM_CLASSES), lambda i, nv: (0, 0)),
        ],
        out_specs=pl.BlockSpec((1, 8, LANE), lambda i, nv: (i, 0, 0)),
    )
    partial_sums = pl.pallas_call(
        _fused_task_kernel,
        out_shape=jax.ShapeDtypeStruct((num_tiles, 8, LANE), jnp.float32),
        grid_spec=grid_spec,
        compiler_params=pltpu.CompilerParams(
            dimension_semantics=("parallel",)),        # v7x: shard tiles over 2 TCs
    )(nvalid, xm, w_enc, b_enc, w1, b1, w2, b2)

    # CrossEntropyLoss(reduction='mean') over the valid masked rows.
    return jnp.sum(partial_sums[:, 0, 0]) / nvalid[0].astype(jnp.float32)


# ------------------------------- the task ------------------------------------
class AtomNumberTaskPallas:
    def __init__(self, key):
        ks = jax.random.split(key, 6)
        self.feature = 'possible_atomic_num_list'
        self.task_feature_idx = allowable_features_index[self.feature]
        num_classes = len(allowable_features[self.feature])
        assert HIDDEN_DIMS[-1] == num_classes, 'because is class num'

        # stand-in backbone params (f32: elementwise VPU/EUP path, v5e-safe)
        self.w_enc = jax.random.normal(ks[0], (NUM_NODE_FEATS, EMBED_DIM), jnp.float32) * 0.1
        self.b_enc = jax.random.normal(ks[1], (1, EMBED_DIM), jnp.float32) * 0.5
        # MLP params: weights in bf16 (MXU operands), biases in f32 (VPU adds)
        self.w1 = (jax.random.normal(ks[2], (EMBED_DIM, HIDDEN_DIMS[0]), jnp.float32)
                   / np.sqrt(EMBED_DIM)).astype(jnp.bfloat16)
        self.b1 = jax.random.normal(ks[3], (1, HIDDEN_DIMS[0]), jnp.float32) * 0.1
        self.w2 = (jax.random.normal(ks[4], (HIDDEN_DIMS[0], HIDDEN_DIMS[1]), jnp.float32)
                   / np.sqrt(HIDDEN_DIMS[0])).astype(jnp.bfloat16)
        self.b2 = jax.random.normal(ks[5], (1, HIDDEN_DIMS[1]), jnp.float32) * 0.1

    @staticmethod
    def choose_indices(key, ptr, mask_rate):
        # Same semantics as Task.choose_indices. Only the (shape-determining)
        # per-graph counts use host ptr; the random draw stays on device.
        ptr_np = np.asarray(ptr)
        sizes = ptr_np[1:] - ptr_np[:-1]
        num_hidden = np.clip((sizes * mask_rate).astype(np.int64), 1, None)
        hidden_to_batch = np.repeat(np.arange(sizes.shape[0]), num_hidden)
        m = int(num_hidden.sum())
        u = jax.random.uniform(key, (m,))
        chosen = (u * jnp.asarray(sizes[hidden_to_batch], jnp.float32)).astype(jnp.int32)
        chosen = chosen + jnp.asarray(ptr_np[:-1][hidden_to_batch], jnp.int32)
        return chosen                                              # device int32 [m]

    def forward(self, x, ptr, mask_key):
        mask = self.choose_indices(mask_key, ptr, MASK_RATE)
        m = int(mask.shape[0])                                     # static (from host ptr)
        # bucket M to a fixed power-of-two multiple of TILE_M -> kernel shape reuse
        m_pad = max(TILE_M, int(pl.next_power_of_2(m)))
        num_tiles = m_pad // TILE_M
        mask_pad = jnp.zeros((m_pad,), jnp.int32).at[:m].set(mask)
        nvalid = jnp.asarray([m], jnp.int32)
        return _task_step(x, mask_pad, nvalid,
                          self.w_enc, self.b_enc, self.w1, self.b1,
                          self.w2, self.b2, num_tiles=num_tiles)


# ------------------------------ pure-JAX reference ----------------------------
def reference_loss(task, x, mask):
    """Follows the ORIGINAL structure: zero x[mask], encode ALL nodes with the
    stand-in backbone, gather emb[mask], MLP, mean cross-entropy."""
    labels = x[mask, task.task_feature_idx].astype(jnp.int32)
    xz = x.at[mask].set(0).astype(jnp.float32)
    emb = jnp.tanh(xz @ task.w_enc + task.b_enc)                   # all nodes
    h = jnp.dot(emb[mask].astype(jnp.bfloat16), task.w1,
                preferred_element_type=jnp.float32) + task.b1
    h = jnp.maximum(h, 0.0)
    logits = jnp.dot(h.astype(jnp.bfloat16), task.w2,
                     preferred_element_type=jnp.float32) + task.b2
    lse = jax.nn.logsumexp(logits, axis=-1)
    picked = jnp.take_along_axis(logits, labels[:, None], axis=1)[:, 0]
    return jnp.mean(lse - picked)


if __name__ == "__main__":
    key = jax.random.PRNGKey(0)
    k_task, k_x, k_mask, k_x2, k_mask2 = jax.random.split(key, 5)
    task = AtomNumberTaskPallas(k_task)

    # --- small batch: 2 ligand graphs (10 and 14 nodes) -> single tile -------
    ptr = np.array([0, 10, 24], np.int64)
    x = jax.random.randint(k_x, (int(ptr[-1]), NUM_NODE_FEATS), 0, NUM_CLASSES,
                           dtype=jnp.int32)
    loss = jax.block_until_ready(task.forward(x, ptr, k_mask))
    mask = task.choose_indices(k_mask, ptr, MASK_RATE)
    ref = jax.block_until_ready(reference_loss(task, x, mask))
    assert np.allclose(np.asarray(loss), np.asarray(ref), rtol=5e-3, atol=5e-3), (loss, ref)

    # --- larger batch: exercises the multi-tile grid + padded-row masking ----
    ptr2 = np.array([0, 300, 650], np.int64)
    x2 = jax.random.randint(k_x2, (int(ptr2[-1]), NUM_NODE_FEATS), 0, NUM_CLASSES,
                            dtype=jnp.int32)
    loss2 = jax.block_until_ready(task.forward(x2, ptr2, k_mask2))
    mask2 = task.choose_indices(k_mask2, ptr2, MASK_RATE)
    ref2 = jax.block_until_ready(reference_loss(task, x2, mask2))
    assert np.allclose(np.asarray(loss2), np.asarray(ref2), rtol=5e-3, atol=5e-3), (loss2, ref2)

    print("KERNEL_OK")
</pallas_src>

<mosaic_0001>
module attributes {stable_mosaic.version = 11 : i64} {
  func.func @_fused_task_kernel(%arg0: i32, %arg1: memref<1xi32, #tpu.memory_space<smem>>, %arg2: memref<128x4xi32, #tpu.memory_space<vmem>>, %arg3: memref<4x32xf32, #tpu.memory_space<vmem>>, %arg4: memref<1x32xf32, #tpu.memory_space<vmem>>, %arg5: memref<32x64xbf16, #tpu.memory_space<vmem>>, %arg6: memref<1x64xf32, #tpu.memory_space<vmem>>, %arg7: memref<64x16xbf16, #tpu.memory_space<vmem>>, %arg8: memref<1x16xf32, #tpu.memory_space<vmem>>, %arg9: memref<1x8x128xf32, #tpu.memory_space<vmem>>) attributes {dimension_semantics = [#tpu.dimension_semantics<parallel>], iteration_bounds = array<i64: 1>, scalar_prefetch = 1 : i64, scratch_operands = 0 : i64, tpu.core_type = #tpu.core_type<tc>, window_params = [{transform_indices = @transform_0, window_bounds = array<i64: 128, 4>}, {pipeline_mode = #tpu.pipeline_mode<synchronous>, transform_indices = @transform_1, window_bounds = array<i64: 4, 32>}, {pipeline_mode = #tpu.pipeline_mode<synchronous>, transform_indices = @transform_2, window_bounds = array<i64: 1, 32>}, {pipeline_mode = #tpu.pipeline_mode<synchronous>, transform_indices = @transform_3, window_bounds = array<i64: 32, 64>}, {pipeline_mode = #tpu.pipeline_mode<synchronous>, transform_indices = @transform_4, window_bounds = array<i64: 1, 64>}, {pipeline_mode = #tpu.pipeline_mode<synchronous>, transform_indices = @transform_5, window_bounds = array<i64: 64, 16>}, {pipeline_mode = #tpu.pipeline_mode<synchronous>, transform_indices = @transform_6, window_bounds = array<i64: 1, 16>}, {transform_indices = @transform_7, window_bounds = array<i64: 1, 8, 128>}]} {
    %c0 = arith.constant 0 : index
    %c0_0 = arith.constant 0 : index
    %0 = vector.load %arg2[%c0, %c0_0] : memref<128x4xi32, #tpu.memory_space<vmem>>, vector<128x4xi32>
    %1 = vector.extract_strided_slice %0 {offsets = [0, 0], sizes = [128, 1], strides = [1, 1]} : vector<128x4xi32> to vector<128x1xi32>
    %2 = arith.sitofp %0 : vector<128x4xi32> to vector<128x4xf32>
    %cst = arith.constant 0.000000e+00 : f32
    %3 = vector.broadcast %cst : f32 to vector<128x4xf32>
    %4 = arith.mulf %2, %3 : vector<128x4xf32>
    %c0_1 = arith.constant 0 : index
    %c0_2 = arith.constant 0 : index
    %5 = vector.load %arg4[%c0_1, %c0_2] : memref<1x32xf32, #tpu.memory_space<vmem>>, vector<1x32xf32>
    %6 = vector.shape_cast %5 : vector<1x32xf32> to vector<1x32xf32>
    %7 = vector.broadcast %6 : vector<1x32xf32> to vector<128x32xf32>
    %8 = vector.extract_strided_slice %4 {offsets = [0, 0], sizes = [128, 1], strides = [1, 1]} : vector<128x4xf32> to vector<128x1xf32>
    %c0_3 = arith.constant 0 : index
    %c0_4 = arith.constant 0 : index
    %9 = vector.load %arg3[%c0_3, %c0_4] : memref<4x32xf32, #tpu.memory_space<vmem>>, vector<1x32xf32>
    %10 = vector.broadcast %8 : vector<128x1xf32> to vector<128x32xf32>
    %11 = vector.broadcast %9 : vector<1x32xf32> to vector<128x32xf32>
    %12 = arith.mulf %10, %11 : vector<128x32xf32>
    %13 = arith.addf %7, %12 : vector<128x32xf32>
    %14 = vector.extract_strided_slice %4 {offsets = [0, 1], sizes = [128, 1], strides = [1, 1]} : vector<128x4xf32> to vector<128x1xf32>
    %c1 = arith.constant 1 : index
    %c0_5 = arith.constant 0 : index
    %15 = vector.load %arg3[%c1, %c0_5] : memref<4x32xf32, #tpu.memory_space<vmem>>, vector<1x32xf32>
    %16 = vector.broadcast %14 : vector<128x1xf32> to vector<128x32xf32>
    %17 = vector.broadcast %15 : vector<1x32xf32> to vector<128x32xf32>
    %18 = arith.mulf %16, %17 : vector<128x32xf32>
    %19 = arith.addf %13, %18 : vector<128x32xf32>
    %20 = vector.extract_strided_slice %4 {offsets = [0, 2], sizes = [128, 1], strides = [1, 1]} : vector<128x4xf32> to vector<128x1xf32>
    %c2 = arith.constant 2 : index
    %c0_6 = arith.constant 0 : index
    %21 = vector.load %arg3[%c2, %c0_6] : memref<4x32xf32, #tpu.memory_space<vmem>>, vector<1x32xf32>
    %22 = vector.broadcast %20 : vector<128x1xf32> to vector<128x32xf32>
    %23 = vector.broadcast %21 : vector<1x32xf32> to vector<128x32xf32>
    %24 = arith.mulf %22, %23 : vector<128x32xf32>
    %25 = arith.addf %19, %24 : vector<128x32xf32>
    %26 = vector.extract_strided_slice %4 {offsets = [0, 3], sizes = [128, 1], strides = [1, 1]} : vector<128x4xf32> to vector<128x1xf32>
    %c3 = arith.constant 3 : index
    %c0_7 = arith.constant 0 : index
    %27 = vector.load %arg3[%c3, %c0_7] : memref<4x32xf32, #tpu.memory_space<vmem>>, vector<1x32xf32>
    %28 = vector.broadcast %26 : vector<128x1xf32> to vector<128x32xf32>
    %29 = vector.broadcast %27 : vector<1x32xf32> to vector<128x32xf32>
    %30 = arith.mulf %28, %29 : vector<128x32xf32>
    %31 = arith.addf %25, %30 : vector<128x32xf32>
    %32 = math.tanh %31 : vector<128x32xf32>
    %33 = arith.truncf %32 : vector<128x32xf32> to vector<128x32xbf16>
    %c0_8 = arith.constant 0 : index
    %c0_9 = arith.constant 0 : index
    %34 = vector.load %arg5[%c0_8, %c0_9] : memref<32x64xbf16, #tpu.memory_space<vmem>>, vector<32x64xbf16>
    %cst_10 = arith.constant dense<0.000000e+00> : vector<128x64xf32>
    %35 = tpu.matmul %33, %34, %cst_10 {dimension_numbers = #tpu.dot_dimension_numbers<[1], [0], [0], [1], [0, 0, 1, 1], [], []>} : vector<128x32xbf16>, vector<32x64xbf16>, vector<128x64xf32> -> vector<128x64xf32>
    %c0_11 = arith.constant 0 : index
    %c0_12 = arith.constant 0 : index
    %36 = vector.load %arg6[%c0_11, %c0_12] : memref<1x64xf32, #tpu.memory_space<vmem>>, vector<1x64xf32>
    %37 = vector.broadcast %36 : vector<1x64xf32> to vector<128x64xf32>
    %38 = arith.addf %35, %37 : vector<128x64xf32>
    %cst_13 = arith.constant 0.000000e+00 : f32
    %39 = vector.broadcast %cst_13 : f32 to vector<128x64xf32>
    %40 = arith.maximumf %38, %39 : vector<128x64xf32>
    %41 = arith.truncf %40 : vector<128x64xf32> to vector<128x64xbf16>
    %c0_14 = arith.constant 0 : index
    %c0_15 = arith.constant 0 : index
    %42 = vector.load %arg7[%c0_14, %c0_15] : memref<64x16xbf16, #tpu.memory_space<vmem>>, vector<64x16xbf16>
    %cst_16 = arith.constant dense<0.000000e+00> : vector<128x16xf32>
    %43 = tpu.matmul %41, %42, %cst_16 {dimension_numbers = #tpu.dot_dimension_numbers<[1], [0], [0], [1], [0, 0, 1, 1], [], []>} : vector<128x64xbf16>, vector<64x16xbf16>, vector<128x16xf32> -> vector<128x16xf32>
    %c0_17 = arith.constant 0 : index
    %c0_18 = arith.constant 0 : index
    %44 = vector.load %arg8[%c0_17, %c0_18] : memref<1x16xf32, #tpu.memory_space<vmem>>, vector<1x16xf32>
    %45 = vector.broadcast %44 : vector<1x16xf32> to vector<128x16xf32>
    %46 = arith.addf %43, %45 : vector<128x16xf32>
    %cst_19 = arith.constant dense<0xFF800000> : vector<128xf32>
    %47 = vector.multi_reduction <maximumf>, %46, %cst_19 [1] : vector<128x16xf32> to vector<128xf32>
    %48 = vector.shape_cast %47 : vector<128xf32> to vector<128x1xf32>
    %49 = vector.broadcast %48 : vector<128x1xf32> to vector<128x16xf32>
    %50 = arith.subf %46, %49 : vector<128x16xf32>
    %51 = math.exp %50 : vector<128x16xf32>
    %cst_20 = arith.constant dense<0.000000e+00> : vector<128xf32>
    %52 = vector.multi_reduction <add>, %51, %cst_20 [1] : vector<128x16xf32> to vector<128xf32>
    %53 = vector.shape_cast %52 : vector<128xf32> to vector<128x1xf32>
    %54 = math.log %53 : vector<128x1xf32>
    %55 = arith.addf %48, %54 : vector<128x1xf32>
    %56 = tpu.iota {dimensions = array<i32: 1>} : vector<128x16xi32>
    %57 = vector.broadcast %1 : vector<128x1xi32> to vector<128x16xi32>
    %58 = arith.cmpi eq, %56, %57 : vector<128x16xi32>
    %cst_21 = arith.constant 0.000000e+00 : f32
    %59 = vector.broadcast %cst_21 : f32 to vector<128x16xf32>
    %60 = arith.select %58, %46, %59 : vector<128x16xi1>, vector<128x16xf32>
    %cst_22 = arith.constant dense<0.000000e+00> : vector<128xf32>
    %61 = vector.multi_reduction <add>, %60, %cst_22 [1] : vector<128x16xf32> to vector<128xf32>
    %62 = vector.shape_cast %61 : vector<128xf32> to vector<128x1xf32>
    %63 = arith.subf %55, %62 : vector<128x1xf32>
    %64 = tpu.iota {dimensions = array<i32: 0>} : vector<128x1xi32>
    %c128_i32 = arith.constant 128 : i32
    %65 = arith.muli %arg0, %c128_i32 : i32
    %66 = vector.broadcast %65 : i32 to vector<128x1xi32>
    %67 = arith.addi %64, %66 : vector<128x1xi32>
    %c0_23 = arith.constant 0 : index
    %68 = memref.load %arg1[%c0_23] : memref<1xi32, #tpu.memory_space<smem>>
    %69 = vector.broadcast %68 : i32 to vector<128x1xi32>
    %70 = arith.cmpi slt, %67, %69 : vector<128x1xi32>
    %cst_24 = arith.constant 0.000000e+00 : f32
    %71 = vector.broadcast %cst_24 : f32 to vector<128x1xf32>
    %72 = arith.select %70, %63, %71 : vector<128x1xi1>, vector<128x1xf32>
    %73 = vector.shape_cast %72 : vector<128x1xf32> to vector<1x128x1xf32>
    %cst_25 = arith.constant dense<0.000000e+00> : vector<1xf32>
    %74 = vector.multi_reduction <add>, %73, %cst_25 [1, 2] : vector<1x128x1xf32> to vector<1xf32>
    %75 = vector.shape_cast %74 : vector<1xf32> to vector<1x1x1xf32>
    %76 = vector.extract %75[0, 0, 0] : f32 from vector<1x1x1xf32>
    %77 = vector.broadcast %76 : f32 to vector<1x8x128xf32>
    %c0_26 = arith.constant 0 : index
    %c0_27 = arith.constant 0 : index
    %c0_28 = arith.constant 0 : index
    %78 = vector.load %arg9[%c0_26, %c0_27, %c0_28] : memref<1x8x128xf32, #tpu.memory_space<vmem>>, vector<1x8x128xf32>
    tpu.vector_store %arg9[%c0_26, %c0_27, %c0_28], %77 {strides = array<i32>} : memref<1x8x128xf32, #tpu.memory_space<vmem>>, vector<1x8x128xf32>,
    return
  }
  func.func @transform_0(%arg0: i32, %arg1: memref<1xi32, #tpu.memory_space<smem>>) -> (i32, i32) {
    %c0_i32 = arith.constant 0 : i32
    %c0_i32_0 = arith.constant 0 : i32
    return %arg0, %c0_i32 : i32, i32
  }
  func.func @transform_1(%arg0: i32, %arg1: memref<1xi32, #tpu.memory_space<smem>>) -> (i32, i32) {
    %c0_i32 = arith.constant 0 : i32
    %c0_i32_0 = arith.constant 0 : i32
    %c0_i32_1 = arith.constant 0 : i32
    return %c0_i32, %c0_i32_0 : i32, i32
  }
  func.func @transform_2(%arg0: i32, %arg1: memref<1xi32, #tpu.memory_space<smem>>) -> (i32, i32) {
    %c0_i32 = arith.constant 0 : i32
    %c0_i32_0 = arith.constant 0 : i32
    %c0_i32_1 = arith.constant 0 : i32
    return %c0_i32, %c0_i32_0 : i32, i32
  }
  func.func @transform_3(%arg0: i32, %arg1: memref<1xi32, #tpu.memory_space<smem>>) -> (i32, i32) {
    %c0_i32 = arith.constant 0 : i32
    %c0_i32_0 = arith.constant 0 : i32
    %c0_i32_1 = arith.constant 0 : i32
    return %c0_i32, %c0_i32_0 : i32, i32
  }
  func.func @transform_4(%arg0: i32, %arg1: memref<1xi32, #tpu.memory_space<smem>>) -> (i32, i32) {
    %c0_i32 = arith.constant 0 : i32
    %c0_i32_0 = arith.constant 0 : i32
    %c0_i32_1 = arith.constant 0 : i32
    return %c0_i32, %c0_i32_0 : i32, i32
  }
  func.func @transform_5(%arg0: i32, %arg1: memref<1xi32, #tpu.memory_space<smem>>) -> (i32, i32) {
    %c0_i32 = arith.constant 0 : i32
    %c0_i32_0 = arith.constant 0 : i32
    %c0_i32_1 = arith.constant 0 : i32
    return %c0_i32, %c0_i32_0 : i32, i32
  }
  func.func @transform_6(%arg0: i32, %arg1: memref<1xi32, #tpu.memory_space<smem>>) -> (i32, i32) {
    %c0_i32 = arith.constant 0 : i32
    %c0_i32_0 = arith.constant 0 : i32
    %c0_i32_1 = arith.constant 0 : i32
    return %c0_i32, %c0_i32_0 : i32, i32
  }
  func.func @transform_7(%arg0: i32, %arg1: memref<1xi32, #tpu.memory_space<smem>>) -> (i32, i32, i32) {
    %c0_i32 = arith.constant 0 : i32
    %c0_i32_0 = arith.constant 0 : i32
    %c0_i32_1 = arith.constant 0 : i32
    return %arg0, %c0_i32, %c0_i32_0 : i32, i32, i32
  }
}

</mosaic_0001>

<bundles_post_ra>
// kernel: _task_step.1
= control target key start
LH: loop header
LB: loop body
LE: loop exit
PB: predicated region body
PF: predicated region fallthrough
CT: control target
= control target key end

     0   :  { %v1417_v0 = vmov 1   ;;  %v1418_v1 = vmov 0   ;;  %v1419_v4 = vmov 2   ;;  %v1420_v13 = vmov 3   ;;  %s2197_s1 = inlined_call_operand.vmem [shape: s32[128,4], index: 1, kind: input, shape index: {}]   ;;  %s2198_s2 = inlined_call_operand.vmem [shape: f32[4,32], index: 2, kind: input, shape index: {}]   ;;  %s2199_s3 = inlined_call_operand.vmem [shape: f32[1,32], index: 3, kind: input, shape index: {}]   ;;  %s2200_s4 = inlined_call_operand.vmem [shape: bf16[32,64], index: 4, kind: input, shape index: {}]   ;;  %s2201_s5 = inlined_call_operand.vmem [shape: f32[1,64], index: 5, kind: input, shape index: {}]   ;;  %s2202_s6 = inlined_call_operand.vmem [shape: bf16[64,16], index: 6, kind: input, shape index: {}]   ;;  %s2203_s7 = inlined_call_operand.vmem [shape: f32[1,16], index: 7, kind: input, shape index: {}]   ;;  %s2204_s0 = inlined_call_operand.<no memory space> [shape: s32[1], index: 0, kind: input, shape index: {}]   ;;  %s2205_s8 = inlined_call_operand.vmem [shape: f32[1,8,128], index: 8, kind: output, shape index: {}]  }
   0x1   :  { %1255 = vset.pattern.permute.xlu1 %v1417_v0  ;;  %1254 = vset.pattern.permute.xlu0 %v1418_v1  ;;  %v1471_v2 = vld [vmem:[%s2197_s1] sm:$0xff]  ;;  %v1478_v5 = vld [vmem:[%s2197_s1 + $0x8] sm:$0xff]  ;;  %v1484_v9 = vld [vmem:[%s2197_s1 + $0x10] sm:$0xff]  ;;  %vm533_vm0 = vcmask 261120   ;;  %vm667_vm1 = vcmask 523264   ;;  %vm741_vm3 = vcmask 130048  }
   0x2   :  { %v45_v3 = vcvt.s32.f32 %v1471_v2  ;;  %1256 = vset.pattern.permute.xlu2 %v1419_v4  ;;  %v46_v7 = vcvt.s32.f32 %v1478_v5  ;;  %v47_v10 = vcvt.s32.f32 %v1484_v9  ;;  %v1490_v11 = vld [vmem:[%s2197_s1 + $0x18] sm:$0xff]  ;;  %v1499_v16 = vld [vmem:[%s2197_s1 + $0x30] sm:$0xff]  ;;  %v1508_v19 = vld [vmem:[%s2197_s1 + $0x28] sm:$0xff] }
   0x3   :  { %v48_v14 = vcvt.s32.f32 %v1490_v11  ;;  %v51_v17 = vcvt.s32.f32 %v1499_v16  ;;  %v50_v20 = vcvt.s32.f32 %v1508_v19  ;;  %v1516_v22 = vld [vmem:[%s2197_s1 + $0x40] sm:$0xff]  ;;  %v1536_v28 = vld [vmem:[%s2197_s1 + $0x58] sm:$0xff]  ;;  %v1562_v35 = vld [vmem:[%s2197_s1 + $0x48] sm:$0xff] }
   0x4   :  { %v61_v6 = vmul.f32 0.0, %v45_v3  ;;  %v62_v8 = vmul.f32 0.0, %v46_v7  ;;  %v63_v12 = vmul.f32 0.0, %v47_v10  ;;  %v53_v23 = vcvt.s32.f32 %v1516_v22  ;;  %v1525_v24 = vld [vmem:[%s2197_s1 + $0x20] sm:$0xff]  ;;  %v1547_v31 = vld [vmem:[%s2197_s1 + $0x38] sm:$0xff]  ;;  %v1237_v39 = vld [vmem:[%s2200_s4 + $0x8] sm:$0xff] }
   0x5   :  { %v64_v15 = vmul.f32 0.0, %v48_v14  ;;  %v67_v18 = vmul.f32 0.0, %v51_v17  ;;  %v66_v21 = vmul.f32 0.0, %v50_v20  ;;  %v49_v26 = vcvt.s32.f32 %v1525_v24  ;;  %564 = vmatpush.bf16.msra.mxu0 %v1237_v39  ;;  %v1574_v40 = vld [vmem:[%s2197_s1 + $0x50] sm:$0xff]  ;;  %1242 = vmatpush.bf16.msra.mxu3 %v1237_v39  ;;  %v1236_v42 = vld [vmem:[%s2200_s4] sm:$0xff]  ;;  %v1634_v20 = vld [vmem:[%s2197_s1 + $0x68] sm:$0xff] }
   0x6   :  { %197 = vperm.xlu1 %1255, %v61_v6   ;;  %84 = vperm.xlu0 %1254, %v61_v6   ;;  %v1527_v25 = vmul.f32 0.0, %v53_v23  ;;  %v56_v29 = vcvt.s32.f32 %v1536_v28  ;;  %v52_v32 = vcvt.s32.f32 %v1547_v31  ;;  %v54_v37 = vcvt.s32.f32 %v1562_v35  ;;  %v1590_v47 = vld [vmem:[%s2198_s2] ss:$0 sm:$0xff]  ;;  %v1606_v51 = vld [vmem:[%s2198_s2 + $0x1] ss:$0 sm:$0xff] }
   0x7   :  { %295 = vperm.xlu2 %1256, %v61_v6   ;;  %v65_v27 = vmul.f32 0.0, %v49_v26  ;;  %v55_v41 = vcvt.s32.f32 %v1574_v40  ;;  %v1597_v48 = vld [vmem:[%s2199_s3] ss:$0 sm:$0xff]  ;;  %v1615_v57 = vld [vmem:[%s2198_s2 + $0x2] ss:$0 sm:$0xff] }
   0x8   :  { %v1542_v30 = vmul.f32 0.0, %v56_v29  ;;  %v68_v33 = vmul.f32 0.0, %v52_v32  ;;  %v70_v38 = vmul.f32 0.0, %v54_v37  ;;  %v1624_v62 = vld [vmem:[%s2198_s2 + $0x3] ss:$0 sm:$0xff] }
   0x9   :  { %v1583_v44 = vmul.f32 0.0, %v55_v41  ;;  %565 = vmatpush.bf16.msra.mxu0 %v1236_v42  ;;  %1243 = vmatpush.bf16.msra.mxu3 %v1236_v42 }
   0xe   :  { %201 = vperm.xlu1 %1255, %v62_v8   ;;  %89 = vperm.xlu0 %1254, %v62_v8  }
   0xf   :  { %299 = vperm.xlu2 %1256, %v62_v8  }
  0x16   :  { %1258 = vset.pattern.permute.xlu1 %v1420_v13  ;;  %1257 = vset.pattern.permute.xlu0 %v1420_v13 }
  0x17   :  { %397 = vperm.xlu1 %1258, %v62_v8   ;;  %393 = vperm.xlu0 %1257, %v61_v6  }
  0x18   :  { %1259 = vset.pattern.permute.xlu2 %v1418_v1 }
  0x19   :  { %94 = vperm.xlu2 %1259, %v63_v12  }
  0x1f   :  { %1260 = vset.pattern.permute.xlu1 %v1418_v1  ;;  %1262 = vset.pattern.permute.xlu0 %v1417_v0 }
  0x20   :  { %99 = vperm.xlu1 %1260, %v64_v15   ;;  %209 = vperm.xlu0 %1262, %v64_v15  }
  0x21   :  { %1261 = vset.pattern.permute.xlu2 %v1417_v0 }
  0x22   :  { %205 = vperm.xlu2 %1261, %v63_v12  }
  0x28   :  { %1263 = vset.pattern.permute.xlu1 %v1419_v4  ;;  %221 = vperm.xlu0 %1262, %v67_v18  }
  0x29   :  { %303 = vperm.xlu1 %1263, %v63_v12  }
  0x2a   :  { %1264 = vset.pattern.permute.xlu2 %v1419_v4 }
  0x2b   :  { %307 = vperm.xlu2 %1264, %v64_v15  }
  0x30   :  { %1275 = vset.pattern.permute.xlu0 %v1419_v4 }
  0x31   :  { %1265 = vset.pattern.permute.xlu1 %v1420_v13  ;;  %315 = vperm.xlu0 %1275, %v66_v21  }
  0x32   :  { %401 = vperm.xlu1 %1265, %v63_v12  }
  0x33   :  { %1266 = vset.pattern.permute.xlu2 %v1420_v13 }
  0x34   :  { %405 = vperm.xlu2 %1266, %v64_v15  }
  0x39   :  { %327 = vperm.xlu0 %1275, %v1527_v25  }
  0x3a   :  { %1267 = vset.pattern.permute.xlu1 %v1418_v1 }
  0x3b   :  { %109 = vperm.xlu1 %1267, %v66_v21  }
  0x3c   :  { %1268 = vset.pattern.permute.xlu2 %v1417_v0 }
  0x3d   :  { %213 = vperm.xlu2 %1268, %v65_v27  }
  0x41   :  { %1284 = vset.pattern.permute.xlu0 %v1418_v1 }
  0x42   :  { %104 = vperm.xlu0 %1284, %v65_v27  }
  0x43   :  { %1269 = vset.pattern.permute.xlu1 %v1417_v0 }
  0x44   :  { %217 = vperm.xlu1 %1269, %v66_v21  }
  0x45   :  { %1270 = vset.pattern.permute.xlu2 %v1419_v4 }
  0x46   :  { %311 = vperm.xlu2 %1270, %v65_v27  }
  0x4a   :  { %139 = vperm.xlu0 %1284, %v1542_v30  }
  0x4c   :  { %1271 = vset.pattern.permute.xlu1 %v1420_v13 }
  0x4d   :  { %409 = vperm.xlu1 %1271, %v65_v27  }
  0x4e   :  { %1272 = vset.pattern.permute.xlu2 %v1420_v13 }
  0x4f   :  { %413 = vperm.xlu2 %1272, %v66_v21   ;;  %v58_v21 = vcvt.s32.f32 %v1634_v20 }
  0x51   :  { %v1639_v23 = vmul.f32 0.0, %v58_v21 }
  0x52   :  { %1289 = vset.pattern.permute.xlu0 %v1420_v13 }
  0x53   :  { %421 = vperm.xlu0 %1289, %v68_v33  }
  0x55   :  { %1273 = vset.pattern.permute.xlu1 %v1418_v1 }
  0x56   :  { %114 = vperm.xlu1 %1273, %v67_v18  }
  0x57   :  { %1274 = vset.pattern.permute.xlu2 %v1418_v1 }
  0x58   :  { %119 = vperm.xlu2 %1274, %v68_v33  }
  0x5b   :  { %433 = vperm.xlu0 %1289, %v1583_v44  }
  0x5e   :  { %1276 = vset.pattern.permute.xlu1 %v1417_v0 }
  0x5f   :  { %225 = vperm.xlu1 %1276, %v68_v33  }
  0x60   :  { %1277 = vset.pattern.permute.xlu2 %v1419_v4 }
  0x61   :  { %319 = vperm.xlu2 %1277, %v67_v18   ;;  %v296_v34 = vpop.permute.xlu2 %295 }
  0x62   :  { %v359_v63 = vmul.f32 %v1615_v57, %v296_v34 }
  0x63   :  { %1298 = vset.pattern.permute.xlu0 %v1417_v0 }
  0x64   :  { %249 = vperm.xlu0 %1298, %v1639_v23  }
  0x67   :  { %1278 = vset.pattern.permute.xlu1 %v1419_v4 }
  0x68   :  { %323 = vperm.xlu1 %1278, %v68_v33  }
  0x69   :  { %1279 = vset.pattern.permute.xlu2 %v1420_v13  ;;  %v300_v36 = vpop.permute.xlu2 %299 }
  0x6a   :  { %417 = vperm.xlu2 %1279, %v67_v18   ;;  %v360_v3 = vmul.f32 %v1615_v57, %v300_v36 }
  0x6c   :  { %1303 = vset.pattern.permute.xlu0 %v1418_v1 }
  0x70   :  { %1280 = vset.pattern.permute.xlu1 %v1418_v1 }
  0x71   :  { %124 = vperm.xlu1 %1280, %v1527_v25  }
  0x72   :  { %1281 = vset.pattern.permute.xlu2 %v1418_v1 }
  0x73   :  { %129 = vperm.xlu2 %1281, %v70_v38   ;;  %v1581_v43 = vpop.permute.xlu2 %94 }
  0x74   :  { %v165_v39 = vmul.f32 %v1590_v47, %v1581_v43 }
  0x78   :  { %v198_v45 = vpop.permute.xlu1 %197  ;;  %v85_v46 = vpop.permute.xlu0 %84 }
  0x79   :  { %1282 = vset.pattern.permute.xlu1 %v1417_v0  ;;  %v163_v49 = vmul.f32 %v1590_v47, %v85_v46  ;;  %v261_v58 = vmul.f32 %v1606_v51, %v198_v45 }
  0x7a   :  { %229 = vperm.xlu1 %1282, %v1527_v25  }
  0x7b   :  { %1283 = vset.pattern.permute.xlu2 %v1417_v0  ;;  %v179_v55 = vadd.f32 %v1597_v48, %v163_v49  ;;  %v1661_v49 = vld [vmem:[%s2197_s1 + $0x60] sm:$0xff] }
  0x7c   :  { %233 = vperm.xlu2 %1283, %v70_v38   ;;  %v1600_v50 = vpop.permute.xlu2 %205 }
  0x7d   :  { %v277_v60 = vadd.f32 %v261_v58, %v179_v55 }
  0x7f   :  { %v375_v14 = vadd.f32 %v359_v63, %v277_v60 }
  0x80   :  { %v202_v52 = vpop.permute.xlu1 %201  ;;  %v90_v53 = vpop.permute.xlu0 %89 }
  0x81   :  { %v164_v54 = vmul.f32 %v1590_v47, %v90_v53  ;;  %v262_v59 = vmul.f32 %v1606_v51, %v202_v52  ;;  %v181_v52 = vadd.f32 %v1597_v48, %v165_v39  ;;  %v263_v53 = vmul.f32 %v1606_v51, %v1600_v50 }
  0x82   :  { %1285 = vset.pattern.permute.xlu1 %v1419_v4 }
  0x83   :  { %v180_v56 = vadd.f32 %v1597_v48, %v164_v54  ;;  %331 = vperm.xlu1 %1285, %v70_v38  }
  0x84   :  { %1286 = vset.pattern.permute.xlu2 %v1420_v13 }
  0x85   :  { %425 = vperm.xlu2 %1286, %v1527_v25   ;;  %v278_v61 = vadd.f32 %v262_v59, %v180_v56  ;;  %v308_v6 = vpop.permute.xlu2 %307  ;;  %v279_v56 = vadd.f32 %v263_v53, %v181_v52 }
  0x86   :  { %v362_v45 = vmul.f32 %v1615_v57, %v308_v6  ;;  %v1675_v6 = vld [vmem:[%s2197_s1 + $0x70] sm:$0xff] }
  0x87   :  { %v376_v10 = vadd.f32 %v360_v3, %v278_v61 }
  0x89   :  { %v398_v7 = vpop.permute.xlu1 %397  ;;  %v394_v8 = vpop.permute.xlu0 %393 }
  0x8a   :  { %v458_v12 = vmul.f32 %v1624_v62, %v398_v7  ;;  %v457_v15 = vmul.f32 %v1624_v62, %v394_v8  ;;  %v59_v7 = vcvt.s32.f32 %v1675_v6 }
  0x8b   :  { %1287 = vset.pattern.permute.xlu1 %v1420_v13 }
  0x8c   :  { %v474_v17 = vadd.f32 %v458_v12, %v376_v10  ;;  %v473_v18 = vadd.f32 %v457_v15, %v375_v14  ;;  %429 = vperm.xlu1 %1287, %v70_v38   ;;  %v1681_v10 = vmul.f32 0.0, %v59_v7  ;;  %v1689_v14 = vld [vmem:[%s2197_s1 + $0x78] sm:$0xff] }
  0x8d   :  { %1288 = vset.pattern.permute.xlu2 %v1418_v1 }
  0x8e   :  { %1321 = vtanh.f32 %v474_v17  ;;  %134 = vperm.xlu2 %1288, %v1583_v44   ;;  %v406_v27 = vpop.permute.xlu2 %405  ;;  %154 = vperm.xlu0 %1303, %v1681_v10  }
  0x8f   :  { %1323 = vtanh.f32 %v473_v18  ;;  %v460_v54 = vmul.f32 %v1624_v62, %v406_v27 }
  0x92   :  { %v100_v25 = vpop.permute.xlu1 %99  ;;  %v210_v26 = vpop.permute.xlu0 %209 }
  0x93   :  { %v166_v32 = vmul.f32 %v1590_v47, %v100_v25  ;;  %v264_v37 = vmul.f32 %v1606_v51, %v210_v26 }
  0x94   :  { %v1322_v29 = vpop.eup %1321  ;;  %1290 = vset.pattern.permute.xlu1 %v1417_v0 }
  0x95   :  { %v1324_v33 = vpop.eup %1323  ;;  %237 = vperm.xlu1 %1290, %v1583_v44   ;;  %v182_v36 = vadd.f32 %v1597_v48, %v166_v32 }
  0x96   :  { %v505_v34 = vpack.c.bf16 %v1322_v29, %v1324_v33  ;;  %1291 = vset.pattern.permute.xlu2 %v1417_v0  ;;  %1308 = vset.pattern.permute.xlu0 %v1419_v4 }
  0x97   :  { %241 = vperm.xlu2 %1291, %v1542_v30   ;;  %v214_v42 = vpop.permute.xlu2 %213  ;;  %v280_v46 = vadd.f32 %v264_v37, %v182_v36 }
  0x98   :  { %1204 = vmatmul.msk.bf16.vlgmr.msra.gmra.mxu0 %vm533_vm0, %v505_v34 }
  0x99   :  { %v378_v43 = vadd.f32 %v362_v45, %v280_v46  ;;  %v265_v46 = vmul.f32 %v1606_v51, %v214_v42 }
  0x9a   :  { %v1651_v38 = vpop.permute.xlu0 %221 }
  0x9b   :  { %v304_v41 = vpop.permute.xlu1 %303  ;;  %v476_v59 = vadd.f32 %v460_v54, %v378_v43 }
  0x9c   :  { %v361_v55 = vmul.f32 %v1615_v57, %v304_v41 }
  0x9d   :  { %1292 = vset.pattern.permute.xlu1 %v1419_v4  ;;  %1325 = vtanh.f32 %v476_v59 }
  0x9e   :  { %335 = vperm.xlu1 %1292, %v1583_v44   ;;  %v57_v44 = vcvt.s32.f32 %v1661_v49  ;;  %v377_v61 = vadd.f32 %v361_v55, %v279_v56 }
  0x9f   :  { %1293 = vset.pattern.permute.xlu2 %v1419_v4 }
  0xa0   :  { %339 = vperm.xlu2 %1293, %v1542_v30   ;;  %v312_v3 = vpop.permute.xlu2 %311  ;;  %v73_v50 = vmul.f32 0.0, %v57_v44 }
  0xa1   :  { %v363_v54 = vmul.f32 %v1615_v57, %v312_v3 }
  0xa3   :  { %v316_v58 = vpop.permute.xlu0 %315  ;;  %v1326_v17 = vpop.eup %1325 }
  0xa4   :  { %v402_v60 = vpop.permute.xlu1 %401  ;;  %v364_v34 = vmul.f32 %v1615_v57, %v316_v58 }
  0xa5   :  { %v459_v63 = vmul.f32 %v1624_v62, %v402_v60 }
  0xa6   :  { %1294 = vset.pattern.permute.xlu1 %v1420_v13 }
  0xa7   :  { %v475_v8 = vadd.f32 %v459_v63, %v377_v61  ;;  %437 = vperm.xlu1 %1294, %v1542_v30   ;;  %v60_v30 = vcvt.s32.f32 %v1689_v14 }
  0xa8   :  { %1295 = vset.pattern.permute.xlu2 %v1418_v1 }
  0xa9   :  { %1327 = vtanh.f32 %v475_v8  ;;  %144 = vperm.xlu2 %1295, %v73_v50   ;;  %v414_v21 = vpop.permute.xlu2 %413  ;;  %v1696_v26 = vmul.f32 0.0, %v60_v30 }
  0xaa   :  { %v462_v52 = vmul.f32 %v1624_v62, %v414_v21 }
  0xab   :  { %v1684_v12 = vpop.permute.xlu0 %327  ;;  %355 = vperm.xlu0 %1308, %v1696_v26  }
  0xad   :  { %v110_v15 = vpop.permute.xlu1 %109 }
  0xae   :  { %v168_v27 = vmul.f32 %v1590_v47, %v110_v15 }
  0xaf   :  { %v1328_v18 = vpop.eup %1327  ;;  %1296 = vset.pattern.permute.xlu1 %v1418_v1 }
  0xb0   :  { %149 = vperm.xlu1 %1296, %v1639_v23   ;;  %v506_v25 = vpack.c.bf16 %v1326_v17, %v1328_v18  ;;  %v184_v36 = vadd.f32 %v1597_v48, %v168_v27 }
  0xb1   :  { %1297 = vset.pattern.permute.xlu2 %v1417_v0 }
  0xb2   :  { %1205 = vmatmul.msk.bf16.gmra.mxu0 %vm533_vm0, %v506_v25  ;;  %245 = vperm.xlu2 %1297, %v73_v50   ;;  %v120_v45 = vpop.permute.xlu2 %119 }
  0xb3   :  { %1311 = vset.pattern.permute.xlu0 %v1418_v1  ;;  %v170_v30 = vmul.f32 %v1590_v47, %v120_v45 }
  0xb4   :  { %v105_v29 = vpop.permute.xlu0 %104  ;;  %937 = vperm.xlu0 %1311, %v1471_v2  }
  0xb5   :  { %v167_v32 = vmul.f32 %v1590_v47, %v105_v29  ;;  %v186_v25 = vadd.f32 %v1597_v48, %v170_v30 }
  0xb6   :  { %v218_v33 = vpop.permute.xlu1 %217 }
  0xb7   :  { %v266_v37 = vmul.f32 %v1606_v51, %v218_v33  ;;  %v183_v39 = vadd.f32 %v1597_v48, %v167_v32 }
  0xb8   :  { %1299 = vset.pattern.permute.xlu1 %v1419_v4 }
  0xb9   :  { %v282_v41 = vadd.f32 %v266_v37, %v184_v36  ;;  %343 = vperm.xlu1 %1299, %v73_v50   ;;  %v281_v43 = vadd.f32 %v265_v46, %v183_v39 }
  0xba   :  { %1300 = vset.pattern.permute.xlu2 %v1419_v4 }
  0xbb   :  { %v380_v53 = vadd.f32 %v364_v34, %v282_v41  ;;  %347 = vperm.xlu2 %1300, %v1639_v23   ;;  %v379_v56 = vadd.f32 %v363_v54, %v281_v43  ;;  %v320_v59 = vpop.permute.xlu2 %319 }
  0xbc   :  { %955 = vperm.xlu0 %1311, %v1499_v16   ;;  %v267_v16 = vmul.f32 %v1606_v51, %v1651_v38  ;;  %v365_v15 = vmul.f32 %v1615_v57, %v320_v59 }
  0xbd   :  { %v478_v55 = vadd.f32 %v462_v52, %v380_v53 }
  0xbf   :  { %v410_v44 = vpop.permute.xlu1 %409  ;;  %1329 = vtanh.f32 %v478_v55 }
  0xc0   :  { %v461_v58 = vmul.f32 %v1624_v62, %v410_v44 }
  0xc1   :  { %1301 = vset.pattern.permute.xlu1 %v1420_v13 }
  0xc2   :  { %v477_v42 = vadd.f32 %v461_v58, %v379_v56  ;;  %441 = vperm.xlu1 %1301, %v73_v50  }
  0xc3   :  { %1302 = vset.pattern.permute.xlu2 %v1420_v13 }
  0xc4   :  { %1331 = vtanh.f32 %v477_v42  ;;  %445 = vperm.xlu2 %1302, %v1639_v23   ;;  %v418_v50 = vpop.permute.xlu2 %417  ;;  %v1725_v23 = vpop.permute.xlu0 %139  ;;  %961 = vperm.xlu0 %1311, %v1516_v22  }
  0xc5   :  { %v1330_v60 = vpop.eup %1329  ;;  %v463_v21 = vmul.f32 %v1624_v62, %v418_v50 }
  0xc8   :  { %v115_v2 = vpop.permute.xlu1 %114 }
  0xc9   :  { %v169_v3 = vmul.f32 %v1590_v47, %v115_v2  ;;  %v1238_v2 = vld [vmem:[%s2202_s6] sm:$0xff] }
  0xca   :  { %v1332_v61 = vpop.eup %1331  ;;  %1304 = vset.pattern.permute.xlu1 %v1418_v1 }
  0xcb   :  { %159 = vperm.xlu1 %1304, %v1696_v26   ;;  %v507_v63 = vpack.c.bf16 %v1330_v60, %v1332_v61  ;;  %v185_v7 = vadd.f32 %v1597_v48, %v169_v3 }
  0xcc   :  { %1305 = vset.pattern.permute.xlu2 %v1417_v0  ;;  %967 = vperm.xlu0 %1311, %v1574_v40  }
  0xcd   :  { %1206 = vmatmul.msk.bf16.gmra.mxu0 %vm533_vm0, %v507_v63  ;;  %253 = vperm.xlu2 %1305, %v1681_v10   ;;  %v283_v17 = vadd.f32 %v267_v16, %v185_v7  ;;  %v130_v18 = vpop.permute.xlu2 %129 }
  0xcf   :  { %v381_v38 = vadd.f32 %v365_v15, %v283_v17 }
  0xd1   :  { %v226_v8 = vpop.permute.xlu1 %225  ;;  %v479_v34 = vadd.f32 %v463_v21, %v381_v38 }
  0xd2   :  { %v268_v22 = vmul.f32 %v1606_v51, %v226_v8  ;;  %v174_v8 = vmul.f32 %v1590_v47, %v1725_v23 }
  0xd3   :  { %1306 = vset.pattern.permute.xlu1 %v1417_v0  ;;  %v422_v0 = vpop.permute.xlu0 %421  ;;  %1333 = vtanh.f32 %v479_v34 }
  0xd4   :  { %257 = vperm.xlu1 %1306, %v1696_v26   ;;  %v284_v29 = vadd.f32 %v268_v22, %v186_v25  ;;  %v464_v33 = vmul.f32 %v1624_v62, %v422_v0  ;;  %973 = vperm.xlu0 %1311, %v1661_v49  }
  0xd5   :  { %1307 = vset.pattern.permute.xlu2 %v1419_v4 }
  0xd6   :  { %351 = vperm.xlu2 %1307, %v1681_v10   ;;  %v234_v36 = vpop.permute.xlu2 %233 }
  0xd7   :  { %v270_v43 = vmul.f32 %v1606_v51, %v234_v36 }
  0xd9   :  { %v1334_v39 = vpop.eup %1333 }
  0xda   :  { %v324_v27 = vpop.permute.xlu1 %323 }
  0xdb   :  { %v366_v32 = vmul.f32 %v1615_v57, %v324_v27  ;;  %v434_v38 = vpop.permute.xlu0 %433 }
  0xdc   :  { %1309 = vset.pattern.permute.xlu1 %v1420_v13  ;;  %979 = vperm.xlu0 %1311, %v1675_v6   ;;  %v467_v25 = vmul.f32 %v1624_v62, %v434_v38 }
  0xdd   :  { %v382_v4 = vadd.f32 %v366_v32, %v284_v29  ;;  %449 = vperm.xlu1 %1309, %v1681_v10  }
  0xde   :  { %1310 = vset.pattern.permute.xlu2 %v1420_v13 }
  0xdf   :  { %v480_v40 = vadd.f32 %v464_v33, %v382_v4  ;;  %453 = vperm.xlu2 %1310, %v1696_v26   ;;  %v426_v49 = vpop.permute.xlu2 %425 }
  0xe0   :  { %v465_v54 = vmul.f32 %v1624_v62, %v426_v49 }
  0xe1   :  { %1335 = vtanh.f32 %v480_v40 }
  0xe3   :  { %v125_v37 = vpop.permute.xlu1 %124 }
  0xe4   :  { %v171_v26 = vmul.f32 %v1590_v47, %v125_v37 }
  0xe5   :  { %1312 = vset.pattern.permute.xlu1 %v1418_v1 }
  0xe6   :  { %940 = vperm.xlu1 %1312, %v1478_v5   ;;  %v187_v6 = vadd.f32 %v1597_v48, %v171_v26 }
  0xe7   :  { %v1336_v41 = vpop.eup %1335  ;;  %1313 = vset.pattern.permute.xlu2 %v1418_v1  ;;  %v1241_v1 = vld [vmem:[%s2202_s6 + $0x18] sm:$0xff] }
  0xe8   :  { %v508_v13 = vpack.c.bf16 %v1336_v41, %v1334_v39  ;;  %943 = vperm.xlu2 %1313, %v1484_v9   ;;  %v135_v45 = vpop.permute.xlu2 %134  ;;  %v172_v9 = vmul.f32 %v1590_v47, %v130_v18  ;;  %696 = vmatpush.bf16.msra.mxu1 %v1241_v1 }
  0xe9   :  { %1244 = vmatpush.bf16.msra.mxu2 %v1241_v1  ;;  %v173_v7 = vmul.f32 %v1590_v47, %v135_v45 }
  0xea   :  { %1207 = vmatmul.msk.bf16.gmra.mxu0 %vm533_vm0, %v508_v13  ;;  %v188_v53 = vadd.f32 %v1597_v48, %v172_v9 }
  0xeb   :  { %v189_v30 = vadd.f32 %v1597_v48, %v173_v7 }
  0xec   :  { %v230_v10 = vpop.permute.xlu1 %229  ;;  %v286_v44 = vadd.f32 %v270_v43, %v188_v53 }
  0xed   :  { %v269_v5 = vmul.f32 %v1606_v51, %v230_v10 }
  0xee   :  { %946 = vperm.xlu1 %1312, %v1490_v11   ;;  %v367_v11 = vmul.f32 %v1615_v57, %v1684_v12 }
  0xef   :  { %v285_v52 = vadd.f32 %v269_v5, %v187_v6  ;;  %v250_v6 = vpop.permute.xlu0 %249 }
  0xf0   :  { %949 = vperm.xlu2 %1313, %v1525_v24   ;;  %v1240_v24 = vld [vmem:[%s2202_s6 + $0x10] sm:$0xff] }
  0xf1   :  { %697 = vmatpush.bf16.msra.mxu1 %v1240_v24  ;;  %1245 = vmatpush.bf16.msra.mxu2 %v1240_v24  ;;  %v383_v55 = vadd.f32 %v367_v11, %v285_v52  ;;  %v242_v56 = vpop.permute.xlu2 %241  ;;  %v274_v11 = vmul.f32 %v1606_v51, %v250_v6 }
  0xf2   :  { %v272_v22 = vmul.f32 %v1606_v51, %v242_v56 }
  0xf5   :  { %v332_v46 = vpop.permute.xlu1 %331 }
  0xf6   :  { %982 = vperm.xlu1 %1312, %v1689_v14   ;;  %v368_v12 = vmul.f32 %v1615_v57, %v332_v46  ;;  %v1239_v14 = vld [vmem:[%s2202_s6 + $0x8] sm:$0xff] }
  0xf7   :  { %698 = vmatpush.bf16.msra.mxu1 %v1239_v14  ;;  %1246 = vmatpush.bf16.msra.mxu2 %v1239_v14 }
  0xf8   :  { %952 = vperm.xlu2 %1313, %v1508_v19   ;;  %v481_v19 = vadd.f32 %v465_v54, %v383_v55  ;;  %v384_v42 = vadd.f32 %v368_v12, %v286_v44 }
  0xfa   :  { %1337 = vtanh.f32 %v481_v19  ;;  %v340_v61 = vpop.permute.xlu2 %339 }
  0xfb   :  { %699 = vmatpush.bf16.msra.mxu1 %v1238_v2  ;;  %1247 = vmatpush.bf16.msra.mxu2 %v1238_v2  ;;  %v370_v29 = vmul.f32 %v1615_v57, %v340_v61 }
  0xfe   :  { %v430_v58 = vpop.permute.xlu1 %429 }
  0xff   :  { %v466_v59 = vmul.f32 %v1624_v62, %v430_v58 }
 0x100   :  { %958 = vperm.xlu2 %1313, %v1547_v31   ;;  %v1338_v3 = vpop.eup %1337 }
 0x101   :  { %v482_v60 = vadd.f32 %v466_v59, %v384_v42 }
 0x103   :  { %1339 = vtanh.f32 %v482_v60  ;;  %v145_v15 = vpop.permute.xlu2 %144 }
 0x104   :  { %v175_v52 = vmul.f32 %v1590_v47, %v145_v15  ;;  %v155_v15 = vpop.permute.xlu0 %154 }
 0x106   :  { %v191_v55 = vadd.f32 %v1597_v48, %v175_v52 }
 0x107   :  { %v238_v63 = vpop.permute.xlu1 %237 }
 0x108   :  { %964 = vperm.xlu2 %1313, %v1562_v35   ;;  %v271_v31 = vmul.f32 %v1606_v51, %v238_v63  ;;  %v190_v35 = vadd.f32 %v1597_v48, %v174_v8 }
 0x109   :  { %v1340_v50 = vpop.eup %1339 }
 0x10a   :  { %v509_v16 = vpack.c.bf16 %v1340_v50, %v1338_v3  ;;  %v287_v21 = vadd.f32 %v271_v31, %v189_v30  ;;  %v288_v27 = vadd.f32 %v272_v22, %v190_v35 }
 0x10c   :  { %1208 = vmatmul.msk.bf16.gmra.mxu0 %vm533_vm0, %v509_v16  ;;  %v246_v33 = vpop.permute.xlu2 %245  ;;  %v386_v4 = vadd.f32 %v370_v29, %v288_v27 }
 0x10d   :  { %v273_v12 = vmul.f32 %v1606_v51, %v246_v33 }
 0x10f   :  { %v289_v58 = vadd.f32 %v273_v12, %v191_v55 }
 0x110   :  { %v336_v17 = vpop.permute.xlu1 %335  ;;  %970 = vperm.xlu2 %1313, %v1536_v28   ;;  %v1798_v28 = vld [vmem:[%s2201_s5] ss:$0 sm:$0xff] }
 0x111   :  { %v369_v18 = vmul.f32 %v1615_v57, %v336_v17 }
 0x113   :  { %v385_v0 = vadd.f32 %v369_v18, %v287_v21  ;;  %v177_v21 = vmul.f32 %v1590_v47, %v155_v15 }
 0x115   :  { %v567_v23 = vpop.f32.mrf.mxu0  ;;  %v483_v32 = vadd.f32 %v467_v25, %v385_v0  ;;  %v348_v5 = vpop.permute.xlu2 %347  ;;  %v193_v33 = vadd.f32 %v1597_v48, %v177_v21 }
 0x116   :  { %v568_v36 = vadd.f32 %v1798_v28, %v567_v23  ;;  %v372_v53 = vmul.f32 %v1615_v57, %v348_v5 }
 0x117   :  { %1341 = vtanh.f32 %v483_v32 }
 0x118   :  { %976 = vperm.xlu2 %1313, %v1634_v20   ;;  %v607_v13 = vmax.f32 %v568_v36, 0.0 }
 0x119   :  { %v438_v34 = vpop.permute.xlu1 %437 }
 0x11a   :  { %v468_v40 = vmul.f32 %v1624_v62, %v438_v34 }
 0x11c   :  { %v484_v37 = vadd.f32 %v468_v40, %v386_v4 }
 0x11d   :  { %v569_v39 = vpop.f32.mrf.mxu0  ;;  %v1342_v20 = vpop.eup %1341 }
 0x11e   :  { %1343 = vtanh.f32 %v484_v37  ;;  %v570_v41 = vadd.f32 %v1798_v28, %v569_v39  ;;  %v446_v54 = vpop.permute.xlu2 %445  ;;  %v356_v0 = vpop.permute.xlu0 %355 }
 0x11f   :  { %v470_v56 = vmul.f32 %v1624_v62, %v446_v54  ;;  %v374_v29 = vmul.f32 %v1615_v57, %v356_v0 }
 0x120   :  { %v608_v49 = vmax.f32 %v570_v41, 0.0 }
 0x122   :  { %v623_v10 = vpack.c.bf16 %v608_v49, %v607_v13  ;;  %v150_v26 = vpop.permute.xlu1 %149 }
 0x123   :  { %v176_v1 = vmul.f32 %v1590_v47, %v150_v26 }
 0x124   :  { %v1344_v45 = vpop.eup %1343  ;;  %1228 = vmatmul.msk.bf16.vlgmr.msra.gmra.mxu1 %vm667_vm1, %v623_v10 }
 0x125   :  { %v510_v9 = vpack.c.bf16 %v1344_v45, %v1342_v20  ;;  %v192_v46 = vadd.f32 %v1597_v48, %v176_v1 }
 0x127   :  { %1209 = vmatmul.msk.bf16.vlgmr.msra.gmra.mxu3 %vm533_vm0, %v510_v9  ;;  %v290_v43 = vadd.f32 %v274_v11, %v192_v46  ;;  %v254_v63 = vpop.permute.xlu2 %253 }
 0x128   :  { %v275_v32 = vmul.f32 %v1606_v51, %v254_v63 }
 0x129   :  { %v388_v44 = vadd.f32 %v372_v53, %v290_v43 }
 0x12a   :  { %v291_v39 = vadd.f32 %v275_v32, %v193_v33 }
 0x12b   :  { %v344_v24 = vpop.permute.xlu1 %343  ;;  %v486_v42 = vadd.f32 %v470_v56, %v388_v44 }
 0x12c   :  { %v371_v19 = vmul.f32 %v1615_v57, %v344_v24 }
 0x12d   :  { %1345 = vtanh.f32 %v486_v42 }
 0x12e   :  { %v387_v2 = vadd.f32 %v371_v19, %v289_v58  ;;  %v934_v58 = vlaneseq }
 0x12f   :  { %v572_v14 = vpop.f32.mrf.mxu0 }
 0x130   :  { %v573_v61 = vadd.f32 %v1798_v28, %v572_v14  ;;  %v352_v35 = vpop.permute.xlu2 %351  ;;  %v1841_v42 = vand.u32 127, %v934_v58 }
 0x132   :  { %v609_v7 = vmax.f32 %v573_v61, 0.0 }
 0x133   :  { %v1346_v30 = vpop.eup %1345 }
 0x134   :  { %v442_v59 = vpop.permute.xlu1 %441 }
 0x135   :  { %v469_v60 = vmul.f32 %v1624_v62, %v442_v59  ;;  %v1846_v59 = vld [vmem:[%s2203_s7] ss:$0 sm:$0xff] }
 0x137   :  { %v485_v3 = vadd.f32 %v469_v60, %v387_v2  ;;  %v574_v50 = vpop.f32.mrf.mxu0  ;;  %v938_v2 = vpop.permute.xlu0 %937 }
 0x138   :  { %v575_v16 = vadd.f32 %v1798_v28, %v574_v50  ;;  %vm984_vm2 = vcmp.eq.s32.totalorder %v1841_v42, %v938_v2 }
 0x139   :  { %1347 = vtanh.f32 %v485_v3  ;;  %v454_v34 = vpop.permute.xlu2 %453 }
 0x13a   :  { %v610_v8 = vmax.f32 %v575_v16, 0.0  ;;  %v472_v37 = vmul.f32 %v1624_v62, %v454_v34 }
 0x13c   :  { %v624_v31 = vpack.c.bf16 %v610_v8, %v609_v7 }
 0x13d   :  { %v160_v17 = vpop.permute.xlu1 %159 }
 0x13e   :  { %1229 = vmatmul.msk.bf16.gmra.mxu1 %vm667_vm1, %v624_v31  ;;  %v178_v38 = vmul.f32 %v1590_v47, %v160_v17  ;;  %v373_v47 = vmul.f32 %v1615_v57, %v352_v35 }
 0x13f   :  { %v1348_v18 = vpop.eup %1347 }
 0x140   :  { %v511_v22 = vpack.c.bf16 %v1346_v30, %v1348_v18  ;;  %v194_v23 = vadd.f32 %v1597_v48, %v178_v38  ;;  %v389_v49 = vadd.f32 %v373_v47, %v291_v39 }
 0x142   :  { %1210 = vmatmul.msk.bf16.gmra.mxu3 %vm533_vm0, %v511_v22 }
 0x146   :  { %v258_v25 = vpop.permute.xlu1 %257 }
 0x147   :  { %v276_v27 = vmul.f32 %v1606_v51, %v258_v25  ;;  %v944_v25 = vpop.permute.xlu2 %943 }
 0x148   :  { %vm986_vm5 = vcmp.eq.s32.totalorder %v1841_v42, %v944_v25 }
 0x149   :  { %v292_v4 = vadd.f32 %v276_v27, %v194_v23 }
 0x14a   :  { %v577_v40 = vpop.f32.mrf.mxu0 }
 0x14b   :  { %v390_v36 = vadd.f32 %v374_v29, %v292_v4  ;;  %v578_v26 = vadd.f32 %v1798_v28, %v577_v40 }
 0x14d   :  { %v488_v41 = vadd.f32 %v472_v37, %v390_v36  ;;  %v611_v5 = vmax.f32 %v578_v26, 0.0 }
 0x14f   :  { %v450_v13 = vpop.permute.xlu1 %449  ;;  %1349 = vtanh.f32 %v488_v41 }
 0x150   :  { %v471_v10 = vmul.f32 %v1624_v62, %v450_v13 }
 0x152   :  { %v487_v20 = vadd.f32 %v471_v10, %v389_v49  ;;  %v579_v51 = vpop.f32.mrf.mxu0 }
 0x153   :  { %v580_v48 = vadd.f32 %v1798_v28, %v579_v51  ;;  %v950_v51 = vpop.permute.xlu2 %949 }
 0x154   :  { %1351 = vtanh.f32 %v487_v20  ;;  %vm988_vm7 = vcmp.eq.s32.totalorder %v1841_v42, %v950_v51 }
 0x155   :  { %v612_v45 = vmax.f32 %v580_v48, 0.0  ;;  %v1350_v6 = vpop.eup %1349 }
 0x157   :  { %v625_v1 = vpack.c.bf16 %v612_v45, %v611_v5 }
 0x158   :  { %v941_v16 = vpop.permute.xlu1 %940 }
 0x159   :  { %1230 = vmatmul.msk.bf16.gmra.mxu1 %vm667_vm1, %v625_v1  ;;  %vm985_vm4 = vcmp.eq.s32.totalorder %v1841_v42, %v941_v16  ;;  %v1920_v16 = vpop.permute.xlu0 %955 }
 0x15a   :  { %v1352_v57 = vpop.eup %1351  ;;  %vm990_vm11 = vcmp.eq.s32.totalorder %v1841_v42, %v1920_v16 }
 0x15b   :  { %v512_v9 = vpack.c.bf16 %v1350_v6, %v1352_v57 }
 0x15d   :  { %1211 = vmatmul.msk.bf16.gmra.mxu3 %vm533_vm0, %v512_v9 }
 0x160   :  { %v947_v34 = vpop.permute.xlu1 %946 }
 0x161   :  { %vm987_vm6 = vcmp.eq.s32.totalorder %v1841_v42, %v947_v34 }
 0x167   :  { %v582_v46 = vpop.f32.mrf.mxu0 }
 0x168   :  { %v583_v62 = vadd.f32 %v1798_v28, %v582_v46  ;;  %v953_v46 = vpop.permute.xlu2 %952 }
 0x169   :  { %vm989_vm8 = vcmp.eq.s32.totalorder %v1841_v42, %v953_v46 }
 0x16a   :  { %v613_v24 = vmax.f32 %v583_v62, 0.0 }
 0x16f   :  { %v584_v11 = vpop.f32.mrf.mxu0 }
 0x170   :  { %v585_v52 = vadd.f32 %v1798_v28, %v584_v11 }
 0x172   :  { %v614_v53 = vmax.f32 %v585_v52, 0.0 }
 0x174   :  { %v626_v43 = vpack.c.bf16 %v614_v53, %v613_v24 }
 0x176   :  { %1231 = vmatmul.msk.bf16.gmra.mxu1 %vm667_vm1, %v626_v43 }
 0x189   :  { %v587_v54 = vpop.f32.mrf.mxu0 }
 0x18a   :  { %v588_v55 = vadd.f32 %v1798_v28, %v587_v54 }
 0x18c   :  { %v615_v44 = vmax.f32 %v588_v55, 0.0 }
 0x191   :  { %v589_v12 = vpop.f32.mrf.mxu0 }
 0x192   :  { %v590_v14 = vadd.f32 %v1798_v28, %v589_v12 }
 0x194   :  { %v616_v56 = vmax.f32 %v590_v14, 0.0 }
 0x196   :  { %v627_v19 = vpack.c.bf16 %v616_v56, %v615_v44 }
 0x198   :  { %1232 = vmatmul.msk.bf16.vlgmr.msra.gmra.mxu2 %vm667_vm1, %v627_v19 }
 0x1a1   :  { %v701_v60 = vpop.f32.mrf.mxu1 }
 0x1a2   :  { %v1850_v61 = vadd.f32 %v1846_v59, %v701_v60 }
 0x1a4   :  { %v742_v63 = vsel %vm741_vm3, %v1850_v61, -inf  ;;  %v1000_v3 = vsel %vm984_vm2, %v1850_v61, 0.0 }
 0x1a5   :  { %743 = vmax.xlane.f32.xlu1 %v742_v63  ;;  %v1016_v50 = vsel %vm741_vm3, %v1000_v3, 0.0 }
 0x1a6   :  { %1017 = vadd.xlane.f32.xlu2 %v1016_v50 }
 0x1a9   :  { %v703_v7 = vpop.f32.mrf.mxu1 }
 0x1aa   :  { %v1858_v8 = vadd.f32 %v1846_v59, %v703_v7  ;;  %v592_v31 = vpop.f32.mrf.mxu3 }
 0x1ab   :  { %v593_v18 = vadd.f32 %v1798_v28, %v592_v31  ;;  %v959_v31 = vpop.permute.xlu2 %958 }
 0x1ac   :  { %v1001_v15 = vsel %vm985_vm4, %v1858_v8, 0.0  ;;  %v745_v17 = vsel %vm741_vm3, %v1858_v8, -inf  ;;  %vm991_vm9 = vcmp.eq.s32.totalorder %v1841_v42, %v959_v31 }
 0x1ad   :  { %v1019_v30 = vsel %vm741_vm3, %v1001_v15, 0.0  ;;  %v617_v38 = vmax.f32 %v593_v18, 0.0 }
 0x1ae   :  { %1020 = vadd.xlane.f32.xlu0 %v1019_v30  ;;  %746 = vmax.xlane.f32.xlu2 %v745_v17  ;;  %v1927_v30 = vpop.permute.xlu0 %961 }
 0x1af   :  { %vm992_vm10 = vcmp.eq.s32.totalorder %v1841_v42, %v1927_v30 }
 0x1b2   :  { %v594_v35 = vpop.f32.mrf.mxu3 }
 0x1b3   :  { %v595_v22 = vadd.f32 %v1798_v28, %v594_v35  ;;  %v1929_v18 = vpop.permute.xlu2 %964 }
 0x1b4   :  { %vm993_vm12 = vcmp.eq.s32.totalorder %v1841_v42, %v1929_v18 }
 0x1b5   :  { %v618_v21 = vmax.f32 %v595_v22, 0.0 }
 0x1b6   :  { %v1931_v35 = vpop.permute.xlu0 %967 }
 0x1b7   :  { %v628_v0 = vpack.c.bf16 %v618_v21, %v617_v38  ;;  %vm994_vm15 = vcmp.eq.s32.totalorder %v1841_v42, %v1931_v35 }
 0x1b9   :  { %1233 = vmatmul.msk.bf16.gmra.mxu2 %vm667_vm1, %v628_v0 }
 0x1bb   :  { %v706_v23 = vpop.f32.mrf.mxu1  ;;  %v1933_v22 = vpop.permute.xlu2 %970 }
 0x1bc   :  { %v1869_v27 = vadd.f32 %v1846_v59, %v706_v23  ;;  %vm995_vm13 = vcmp.eq.s32.totalorder %v1841_v42, %v1933_v22 }
 0x1be   :  { %v748_v29 = vsel %vm741_vm3, %v1869_v27, -inf  ;;  %v1002_v32 = vsel %vm986_vm5, %v1869_v27, 0.0  ;;  %v1938_v0 = vpop.permute.xlu0 %973 }
 0x1bf   :  { %749 = vmax.xlane.f32.xlu0 %v748_v29  ;;  %v1022_v33 = vsel %vm741_vm3, %v1002_v32, 0.0  ;;  %v1944_v29 = vpop.permute.xlu1 %982 }
 0x1c0   :  { %1023 = vadd.xlane.f32.xlu2 %v1022_v33  ;;  %vm999_vm2 = vcmp.eq.s32.totalorder %v1841_v42, %v1944_v29 }
 0x1c3   :  { %v708_v4 = vpop.f32.mrf.mxu1  ;;  %v1942_v23 = vpop.permute.xlu2 %976 }
 0x1c4   :  { %v1877_v40 = vadd.f32 %v1846_v59, %v708_v4  ;;  %vm997_vm0 = vcmp.eq.s32.totalorder %v1841_v42, %v1942_v23 }
 0x1c5   :  { %v597_v36 = vpop.f32.mrf.mxu3 }
 0x1c6   :  { %v1003_v37 = vsel %vm987_vm6, %v1877_v40, 0.0  ;;  %v751_v39 = vsel %vm741_vm3, %v1877_v40, -inf  ;;  %v598_v41 = vadd.f32 %v1798_v28, %v597_v36  ;;  %v1951_v4 = vpop.permute.xlu0 %979  ;;  %vm1149_vm6 = vcmask 7168  }
 0x1c7   :  { %v1025_v47 = vsel %vm741_vm3, %v1003_v37, 0.0  ;;  %vm998_vm14 = vcmp.eq.s32.totalorder %v1841_v42, %v1951_v4 }
 0x1c8   :  { %1026 = vadd.xlane.f32.xlu1 %v1025_v47  ;;  %752 = vmax.xlane.f32.xlu2 %v751_v39  ;;  %v619_v10 = vmax.f32 %v598_v41, 0.0 }
 0x1cd   :  { %v599_v13 = vpop.f32.mrf.mxu3 }
 0x1ce   :  { %v600_v49 = vadd.f32 %v1798_v28, %v599_v13 }
 0x1d0   :  { %v620_v26 = vmax.f32 %v600_v49, 0.0 }
 0x1d2   :  { %v629_v20 = vpack.c.bf16 %v620_v26, %v619_v10 }
 0x1d4   :  { %1234 = vmatmul.msk.bf16.gmra.mxu2 %vm667_vm1, %v629_v20 }
 0x1d6   :  { %v711_v48 = vpop.f32.mrf.mxu1 }
 0x1d7   :  { %v1888_v5 = vadd.f32 %v1846_v59, %v711_v48 }
 0x1d9   :  { %v754_v45 = vsel %vm741_vm3, %v1888_v5, -inf  ;;  %v1004_v1 = vsel %vm988_vm7, %v1888_v5, 0.0 }
 0x1da   :  { %755 = vmax.xlane.f32.xlu1 %v754_v45  ;;  %v1028_v6 = vsel %vm741_vm3, %v1004_v1, 0.0 }
 0x1db   :  { %1029 = vadd.xlane.f32.xlu0 %v1028_v6 }
 0x1de   :  { %v713_v57 = vpop.f32.mrf.mxu1 }
 0x1df   :  { %v1895_v9 = vadd.f32 %v1846_v59, %v713_v57 }
 0x1e0   :  { %v602_v62 = vpop.f32.mrf.mxu3 }
 0x1e1   :  { %v757_v11 = vsel %vm741_vm3, %v1895_v9, -inf  ;;  %v1005_v52 = vsel %vm989_vm8, %v1895_v9, 0.0  ;;  %v603_v24 = vadd.f32 %v1798_v28, %v602_v62 }
 0x1e2   :  { %758 = vmax.xlane.f32.xlu2 %v757_v11  ;;  %v1031_v54 = vsel %vm741_vm3, %v1005_v52, 0.0 }
 0x1e3   :  { %v621_v55 = vmax.f32 %v603_v24, 0.0 }
 0x1e8   :  { %v604_v53 = vpop.f32.mrf.mxu3 }
 0x1e9   :  { %v605_v43 = vadd.f32 %v1798_v28, %v604_v53 }
 0x1ea   :  { %1032 = vadd.xlane.f32.xlu2 %v1031_v54 }
 0x1eb   :  { %v622_v12 = vmax.f32 %v605_v43, 0.0 }
 0x1ed   :  { %v630_v14 = vpack.c.bf16 %v622_v12, %v621_v55 }
 0x1ef   :  { %1235 = vmatmul.msk.bf16.gmra.mxu2 %vm667_vm1, %v630_v14  ;;  %vm996_vm1 = vcmp.eq.s32.totalorder %v1841_v42, %v1938_v0 }
 0x1f3   :  { %v716_v44 = vpop.f32.mrf.mxu1 }
 0x1f4   :  { %v1906_v56 = vadd.f32 %v1846_v59, %v716_v44 }
 0x1f6   :  { %v760_v19 = vsel %vm741_vm3, %v1906_v56, -inf }
 0x1f7   :  { %761 = vmax.xlane.f32.xlu0 %v760_v19 }
 0x1fb   :  { %v718_v2 = vpop.f32.mrf.mxu1 }
 0x1fc   :  { %v1911_v60 = vadd.f32 %v1846_v59, %v718_v2 }
 0x1fe   :  { %v763_v28 = vsel %vm741_vm3, %v1911_v60, -inf  ;;  %v1007_v1 = vsel %vm991_vm9, %v1911_v60, 0.0 }
 0x1ff   :  { %764 = vmax.xlane.f32.xlu1 %v763_v28  ;;  %v1037_v62 = vsel %vm741_vm3, %v1007_v1, 0.0 }
 0x218   :  { %v1955_v37 = vpop.xlane.xlu1 %743 }
 0x219   :  { %v1953_v36 = vpop.xlane.xlu2 %1017  ;;  %v790_v19 = vsub.f32 %v1850_v61, %v1955_v37 }
 0x21b   :  { %v721_v63 = vpop.f32.mrf.mxu2 }
 0x21c   :  { %v1916_v3 = vadd.f32 %v1846_v59, %v721_v63  ;;  %v806_v63 = vmul.f32 1.442695, %v790_v19 }
 0x21e   :  { %v766_v50 = vsel %vm741_vm3, %v1916_v3, -inf }
 0x21f   :  { %767 = vmax.xlane.f32.xlu2 %v766_v50 }
 0x221   :  { %v1957_v39 = vpop.xlane.xlu0 %1020  ;;  %v1959_v47 = vpop.xlane.xlu2 %746 }
 0x222   :  { %v791_v10 = vsub.f32 %v1858_v8, %v1959_v47 }
 0x223   :  { %v723_v7 = vpop.f32.mrf.mxu2 }
 0x224   :  { %v1923_v15 = vadd.f32 %v1846_v59, %v723_v7  ;;  %v808_v51 = vmul.f32 1.442695, %v791_v10 }
 0x226   :  { %v769_v17 = vsel %vm741_vm3, %v1923_v15, -inf  ;;  %1353 = vpow2.f32 %v808_v51 }
 0x227   :  { %770 = vmax.xlane.f32.xlu0 %v769_v17  ;;  %v1008_v17 = vsel %vm992_vm10, %v1916_v3, 0.0 }
 0x228   :  { %v1040_v30 = vsel %vm741_vm3, %v1008_v17, 0.0 }
 0x22c   :  { %v1354_v52 = vpop.eup %1353 }
 0x22d   :  { %v841_v53 = vsel %vm741_vm3, %v1354_v52, 0.0 }
 0x232   :  { %v1968_v26 = vpop.xlane.xlu0 %749 }
 0x233   :  { %v1991_v54 = vpop.xlane.xlu2 %1023  ;;  %v792_v10 = vsub.f32 %v1869_v27, %v1968_v26  ;;  %v1009_v27 = vsel %vm993_vm12, %v1923_v15, 0.0 }
 0x235   :  { %v810_v16 = vmul.f32 1.442695, %v792_v10 }
 0x23b   :  { %v1961_v41 = vpop.xlane.xlu1 %1026  ;;  %v2003_v50 = vpop.xlane.xlu2 %752 }
 0x23c   :  { %v726_v38 = vpop.f32.mrf.mxu2  ;;  %v793_v61 = vsub.f32 %v1877_v40, %v2003_v50 }
 0x23d   :  { %v1936_v21 = vadd.f32 %v1846_v59, %v726_v38 }
 0x23f   :  { %v772_v25 = vsel %vm741_vm3, %v1936_v21, -inf  ;;  %v1010_v4 = vsel %vm994_vm15, %v1936_v21, 0.0 }
 0x240   :  { %773 = vmax.xlane.f32.xlu1 %v772_v25 }
 0x244   :  { %v728_v32 = vpop.f32.mrf.mxu2 }
 0x245   :  { %v1947_v33 = vadd.f32 %v1846_v59, %v728_v32  ;;  %v812_v32 = vmul.f32 1.442695, %v793_v61 }
 0x247   :  { %v775_v34 = vsel %vm741_vm3, %v1947_v33, -inf }
 0x248   :  { %776 = vmax.xlane.f32.xlu2 %v775_v34 }
 0x24d   :  { %v1973_v48 = vpop.xlane.xlu1 %755 }
 0x24e   :  { %v794_v8 = vsub.f32 %v1888_v5, %v1973_v48  ;;  %v1981_v57 = vpop.xlane.xlu0 %1029 }
 0x250   :  { %v814_v11 = vmul.f32 1.442695, %v794_v8 }
 0x252   :  { %1355 = vpow2.f32 %v814_v11 }
 0x255   :  { %v2017_v34 = vpop.xlane.xlu2 %758 }
 0x256   :  { %v795_v40 = vsub.f32 %v1895_v9, %v2017_v34 }
 0x257   :  { %v731_v13 = vpop.f32.mrf.mxu2 }
 0x258   :  { %v1964_v49 = vadd.f32 %v1846_v59, %v731_v13  ;;  %v1356_v55 = vpop.eup %1355  ;;  %v1006_v13 = vsel %vm990_vm11, %v1906_v56, 0.0 }
 0x259   :  { %v850_v14 = vsel %vm741_vm3, %v1356_v55, 0.0 }
 0x25a   :  { %v778_v20 = vsel %vm741_vm3, %v1964_v49, -inf }
 0x25b   :  { %779 = vmax.xlane.f32.xlu0 %v778_v20  ;;  %v1034_v20 = vsel %vm741_vm3, %v1006_v13, 0.0 }
 0x25d   :  { %v2030_v8 = vpop.xlane.xlu2 %1032 }
 0x25f   :  { %v733_v45 = vpop.f32.mrf.mxu2 }
 0x260   :  { %v1977_v6 = vadd.f32 %v1846_v59, %v733_v45  ;;  %v816_v45 = vmul.f32 1.442695, %v795_v40 }
 0x262   :  { %v781_v46 = vsel %vm741_vm3, %v1977_v6, -inf }
 0x263   :  { %782 = vmax.xlane.f32.xlu1 %v781_v46  ;;  %1038 = vadd.xlane.f32.xlu0 %v1037_v62  ;;  %v1043_v46 = vsel %vm741_vm3, %v1009_v27, 0.0 }
 0x26a   :  { %v1986_v24 = vpop.xlane.xlu0 %761 }
 0x26b   :  { %v796_v43 = vsub.f32 %v1906_v56, %v1986_v24  ;;  %842 = vadd.xlane.f32.xlu0 %v841_v53 }
 0x26d   :  { %v818_v5 = vmul.f32 1.442695, %v796_v43 }
 0x26f   :  { %1357 = vpow2.f32 %v818_v5 }
 0x270   :  { %1359 = vpow2.f32 %v806_v63 }
 0x271   :  { %1361 = vpow2.f32 %v812_v32 }
 0x272   :  { %v736_v12 = vpop.f32.mrf.mxu2  ;;  %v2028_v1 = vpop.xlane.xlu1 %764  ;;  %1363 = vpow2.f32 %v810_v16 }
 0x273   :  { %v1995_v44 = vadd.f32 %v1846_v59, %v736_v12  ;;  %851 = vadd.xlane.f32.xlu0 %v850_v14  ;;  %1365 = vpow2.f32 %v816_v45  ;;  %v797_v9 = vsub.f32 %v1911_v60, %v2028_v1 }
 0x275   :  { %v784_v2 = vsel %vm741_vm3, %v1995_v44, -inf  ;;  %v1358_v28 = vpop.eup %1357  ;;  %v820_v18 = vmul.f32 1.442695, %v797_v9 }
 0x276   :  { %785 = vmax.xlane.f32.xlu2 %v784_v2  ;;  %v856_v31 = vsel %vm741_vm3, %v1358_v28, 0.0 }
 0x277   :  { %1367 = vpow2.f32 %v820_v18 }
 0x27a   :  { %v738_v7 = vpop.f32.mrf.mxu2 }
 0x27b   :  { %v2008_v38 = vadd.f32 %v1846_v59, %v738_v7  ;;  %857 = vadd.xlane.f32.xlu0 %v856_v31  ;;  %v1360_v59 = vpop.eup %1359 }
 0x27c   :  { %v838_v51 = vsel %vm741_vm3, %v1360_v59, 0.0  ;;  %v1362_v56 = vpop.eup %1361 }
 0x27d   :  { %v787_v25 = vsel %vm741_vm3, %v2008_v38, -inf  ;;  %v847_v62 = vsel %vm741_vm3, %v1362_v56, 0.0  ;;  %v1364_v11 = vpop.eup %1363 }
 0x27e   :  { %788 = vmax.xlane.f32.xlu1 %v787_v25  ;;  %1041 = vadd.xlane.f32.xlu2 %v1040_v30  ;;  %v1366_v52 = vpop.eup %1365  ;;  %v844_v60 = vsel %vm741_vm3, %v1364_v11, 0.0  ;;  %v1011_v11 = vsel %vm995_vm13, %v1947_v33, 0.0 }
 0x27f   :  { %v853_v55 = vsel %vm741_vm3, %v1366_v52, 0.0  ;;  %v1368_v12 = vpop.eup %1367 }
 0x280   :  { %v859_v63 = vsel %vm741_vm3, %v1368_v12, 0.0 }
 0x286   :  { %1035 = vadd.xlane.f32.xlu1 %v1034_v20  ;;  %839 = vadd.xlane.f32.xlu2 %v838_v51 }
 0x28e   :  { %1044 = vadd.xlane.f32.xlu1 %v1043_v46  ;;  %848 = vadd.xlane.f32.xlu2 %v847_v62 }
 0x292   :  { %v2037_v53 = vpop.xlane.xlu2 %767 }
 0x293   :  { %v798_v43 = vsub.f32 %v1916_v3, %v2037_v53 }
 0x295   :  { %v822_v5 = vmul.f32 1.442695, %v798_v43 }
 0x296   :  { %854 = vadd.xlane.f32.xlu2 %v853_v55  ;;  %845 = vadd.xlane.f32.xlu1 %v844_v60  ;;  %v1014_v60 = vsel %vm998_vm14, %v1995_v44, 0.0 }
 0x297   :  { %1369 = vpow2.f32 %v822_v5  ;;  %v1049_v5 = vsel %vm741_vm3, %v1011_v11, 0.0 }
 0x29a   :  { %v2043_v14 = vpop.xlane.xlu0 %770 }
 0x29b   :  { %v799_v19 = vsub.f32 %v1923_v15, %v2043_v14 }
 0x29d   :  { %v1370_v2 = vpop.eup %1369  ;;  %v824_v28 = vmul.f32 1.442695, %v799_v19 }
 0x29e   :  { %860 = vadd.xlane.f32.xlu1 %v859_v63  ;;  %v862_v3 = vsel %vm741_vm3, %v1370_v2, 0.0  ;;  %v1046_v63 = vsel %vm741_vm3, %v1010_v4, 0.0 }
 0x29f   :  { %1371 = vpow2.f32 %v824_v28  ;;  %863 = vadd.xlane.f32.xlu0 %v862_v3 }
 0x2a5   :  { %v1372_v7 = vpop.eup %1371 }
 0x2a6   :  { %v865_v31 = vsel %vm741_vm3, %v1372_v7, 0.0  ;;  %v1013_v7 = vsel %vm997_vm0, %v1977_v6, 0.0 }
 0x2a7   :  { %866 = vadd.xlane.f32.xlu2 %v865_v31  ;;  %v1012_v31 = vsel %vm996_vm1, %v1964_v49, 0.0  ;;  %v1055_v35 = vsel %vm741_vm3, %v1013_v7, 0.0 }
 0x2b3   :  { %v2050_v17 = vpop.xlane.xlu1 %773 }
 0x2b4   :  { %v800_v61 = vsub.f32 %v1936_v21, %v2050_v17  ;;  %v1052_v21 = vsel %vm741_vm3, %v1012_v31, 0.0 }
 0x2b6   :  { %v826_v25 = vmul.f32 1.442695, %v800_v61  ;;  %v1015_v61 = vsel %vm999_vm2, %v2008_v38, 0.0 }
 0x2b7   :  { %v1061_v23 = vsel %vm741_vm3, %v1015_v61, 0.0 }
 0x2b8   :  { %1373 = vpow2.f32 %v826_v25 }
 0x2bb   :  { %v2054_v15 = vpop.xlane.xlu2 %776 }
 0x2bc   :  { %v801_v30 = vsub.f32 %v1947_v33, %v2054_v15  ;;  %v1058_v33 = vsel %vm741_vm3, %v1014_v60, 0.0 }
 0x2be   :  { %v1374_v32 = vpop.eup %1373  ;;  %v828_v59 = vmul.f32 1.442695, %v801_v30 }
 0x2bf   :  { %v868_v13 = vsel %vm741_vm3, %v1374_v32, 0.0 }
 0x2c0   :  { %1375 = vpow2.f32 %v828_v59  ;;  %869 = vadd.xlane.f32.xlu1 %v868_v13 }
 0x2c6   :  { %v1376_v10 = vpop.eup %1375 }
 0x2c7   :  { %v871_v40 = vsel %vm741_vm3, %v1376_v10, 0.0 }
 0x2c8   :  { %872 = vadd.xlane.f32.xlu0 %v871_v40 }
 0x2ce   :  { %v2060_v20 = vpop.xlane.xlu0 %779 }
 0x2cf   :  { %v802_v51 = vsub.f32 %v1964_v49, %v2060_v20 }
 0x2d1   :  { %v830_v16 = vmul.f32 1.442695, %v802_v51 }
 0x2d3   :  { %1377 = vpow2.f32 %v830_v16 }
 0x2d6   :  { %v2064_v45 = vpop.xlane.xlu1 %782 }
 0x2d7   :  { %v803_v56 = vsub.f32 %v1977_v6, %v2064_v45  ;;  %v2108_v6 = vpop.xlane.xlu0 %1038 }
 0x2d9   :  { %v1378_v27 = vpop.eup %1377  ;;  %v832_v9 = vmul.f32 1.442695, %v803_v56  ;;  %v2113_v56 = vshrl.u32 %v934_v58, 7  ;;  %v2123_v58 = vstv %s2204_s0 }
 0x2da   :  { %v874_v46 = vsel %vm741_vm3, %v1378_v27, 0.0 }
 0x2db   :  { %1379 = vpow2.f32 %v832_v9  ;;  %875 = vadd.xlane.f32.xlu2 %v874_v46  ;;  %v1082_v11 = vadd.s32 8, %v2113_v56 }
 0x2dd   :  { %vm1118_vm4 = vcmp.lt.s32.totalorder %v1082_v11, %v2123_v58 }
 0x2df   :  { %v843_v32 = vpop.xlane.xlu0 %842 }
 0x2e1   :  { %v1380_v62 = vpop.eup %1379 }
 0x2e2   :  { %v877_v18 = vsel %vm741_vm3, %v1380_v62, 0.0 }
 0x2e3   :  { %878 = vadd.xlane.f32.xlu1 %v877_v18 }
 0x2e7   :  { %v852_v29 = vpop.xlane.xlu0 %851 }
 0x2e9   :  { %v2073_v52 = vpop.xlane.xlu2 %785 }
 0x2ea   :  { %v804_v43 = vsub.f32 %v1995_v44, %v2073_v52 }
 0x2eb   :  { %1050 = vadd.xlane.f32.xlu1 %v1049_v5  ;;  %v1083_v5 = vadd.s32 16, %v2113_v56 }
 0x2ec   :  { %v834_v55 = vmul.f32 1.442695, %v804_v43 }
 0x2ed   :  { %vm1119_vm5 = vcmp.lt.s32.totalorder %v1083_v5, %v2123_v58  ;;  %v1088_v5 = vadd.s32 56, %v2113_v56 }
 0x2ee   :  { %1381 = vpow2.f32 %v834_v55 }
 0x2ef   :  { %v858_v43 = vpop.xlane.xlu0 %857  ;;  %vm1124_vm11 = vcmp.lt.s32.totalorder %v1088_v5, %v2123_v58 }
 0x2f1   :  { %v2081_v12 = vpop.xlane.xlu1 %788  ;;  %v2106_v0 = vpop.xlane.xlu2 %1041 }
 0x2f2   :  { %v805_v22 = vsub.f32 %v2008_v38, %v2081_v12 }
 0x2f3   :  { %1059 = vadd.xlane.f32.xlu1 %v1058_v33 }
 0x2f4   :  { %v1382_v19 = vpop.eup %1381  ;;  %v836_v2 = vmul.f32 1.442695, %v805_v22 }
 0x2f5   :  { %v880_v28 = vsel %vm741_vm3, %v1382_v19, 0.0 }
 0x2f6   :  { %1383 = vpow2.f32 %v836_v2  ;;  %881 = vadd.xlane.f32.xlu0 %v880_v28  ;;  %v1084_v28 = vadd.s32 24, %v2113_v56 }
 0x2f8   :  { %vm1120_vm7 = vcmp.lt.s32.totalorder %v1084_v28, %v2123_v58 }
 0x2f9   :  { %v2104_v25 = vpop.xlane.xlu1 %1035  ;;  %v840_v30 = vpop.xlane.xlu2 %839 }
 0x2fa   :  { %1385 = vlog2.f32 %v840_v30 }
 0x2fb   :  { %1387 = vlog2.f32 %v843_v32  ;;  %v1086_v32 = vadd.s32 40, %v2113_v56 }
 0x2fc   :  { %v1384_v44 = vpop.eup %1383 }
 0x2fd   :  { %v883_v3 = vsel %vm741_vm3, %v1384_v44, 0.0  ;;  %vm1117_vm3 = vcmp.lt.s32.totalorder %v2113_v56, %v2123_v58  ;;  %vm1122_vm9 = vcmp.lt.s32.totalorder %v1086_v32, %v2123_v58  ;;  %v1092_v32 = vadd.s32 88, %v2113_v56 }
 0x2fe   :  { %1047 = vadd.xlane.f32.xlu0 %v1046_v63  ;;  %884 = vadd.xlane.f32.xlu2 %v883_v3 }
 0x2ff   :  { %vm1128_vm15 = vcmp.lt.s32.totalorder %v1092_v32, %v2123_v58 }
 0x300   :  { %v1386_v42 = vpop.eup %1385 }
 0x301   :  { %v2110_v49 = vpop.xlane.xlu1 %1044  ;;  %v849_v13 = vpop.xlane.xlu2 %848  ;;  %v887_v40 = vmul.f32 0.6931472, %v1386_v42 }
 0x302   :  { %v1388_v38 = vpop.eup %1387 }
 0x303   :  { %v889_v51 = vmul.f32 0.6931472, %v1388_v38  ;;  %v918_v9 = vadd.f32 %v887_v40, %v1955_v37 }
 0x305   :  { %v919_v62 = vadd.f32 %v889_v51, %v1959_v47  ;;  %v1064_v55 = vsub.f32 %v918_v9, %v1953_v36 }
 0x306   :  { %1056 = vadd.xlane.f32.xlu0 %v1055_v35  ;;  %1053 = vadd.xlane.f32.xlu2 %v1052_v21 }
 0x307   :  { %v1065_v47 = vsub.f32 %v919_v62, %v1957_v39  ;;  %v1133_v19 = vsel %vm1117_vm3, %v1064_v55, 0.0 }
 0x308   :  { %v1150_v39 = vsel %vm1149_vm6, %v1133_v19, 0.0 }
 0x309   :  { %v846_v59 = vpop.xlane.xlu1 %845  ;;  %v855_v27 = vpop.xlane.xlu2 %854  ;;  %v1134_v4 = vsel %vm1118_vm4, %v1065_v47, 0.0 }
 0x30a   :  { %1389 = vlog2.f32 %v846_v59  ;;  %v1151_v35 = vsel %vm1149_vm6, %v1134_v4, 0.0 }
 0x30b   :  { %1391 = vlog2.f32 %v849_v13 }
 0x30c   :  { %1393 = vlog2.f32 %v852_v29 }
 0x30d   :  { %1395 = vlog2.f32 %v855_v27 }
 0x30e   :  { %1062 = vadd.xlane.f32.xlu2 %v1061_v23  ;;  %1397 = vlog2.f32 %v858_v43  ;;  %v1152_v23 = vadd.f32 %v1151_v35, %v1150_v39 }
 0x310   :  { %v1390_v10 = vpop.eup %1389 }
 0x311   :  { %v891_v16 = vmul.f32 0.6931472, %v1390_v10  ;;  %v1392_v46 = vpop.eup %1391  ;;  %v861_v36 = vpop.xlane.xlu1 %860 }
 0x312   :  { %v893_v60 = vmul.f32 0.6931472, %v1392_v46  ;;  %v1394_v37 = vpop.eup %1393  ;;  %1399 = vlog2.f32 %v861_v36  ;;  %v864_v31 = vpop.xlane.xlu0 %863  ;;  %v1090_v36 = vadd.s32 72, %v2113_v56 }
 0x313   :  { %v920_v18 = vadd.f32 %v891_v16, %v1968_v26  ;;  %v1396_v22 = vpop.eup %1395  ;;  %v895_v33 = vmul.f32 0.6931472, %v1394_v37  ;;  %1401 = vlog2.f32 %v864_v31 }
 0x314   :  { %v921_v2 = vadd.f32 %v893_v60, %v2003_v50  ;;  %v897_v63 = vmul.f32 0.6931472, %v1396_v22  ;;  %v1085_v50 = vadd.s32 32, %v2113_v56  ;;  %vm1126_vm13 = vcmp.lt.s32.totalorder %v1090_v36, %v2123_v58 }
 0x315   :  { %v1066_v26 = vsub.f32 %v920_v18, %v1991_v54  ;;  %v1398_v54 = vpop.eup %1397  ;;  %v922_v3 = vadd.f32 %v895_v33, %v1973_v48 }
 0x316   :  { %v1067_v7 = vsub.f32 %v921_v2, %v1961_v41  ;;  %v899_v30 = vmul.f32 0.6931472, %v1398_v54  ;;  %v923_v59 = vadd.f32 %v897_v63, %v2017_v34  ;;  %vm1121_vm8 = vcmp.lt.s32.totalorder %v1085_v50, %v2123_v58 }
 0x317   :  { %v1135_v44 = vsel %vm1119_vm5, %v1066_v26, 0.0  ;;  %v1068_v48 = vsub.f32 %v922_v3, %v1981_v57  ;;  %v1087_v57 = vadd.s32 48, %v2113_v56 }
 0x318   :  { %v1153_v21 = vsel %vm1149_vm6, %v1135_v44, 0.0  ;;  %v1136_v41 = vsel %vm1120_vm7, %v1067_v7, 0.0  ;;  %v1400_v42 = vpop.eup %1399  ;;  %v924_v29 = vadd.f32 %v899_v30, %v1986_v24  ;;  %v1069_v10 = vsub.f32 %v923_v59, %v2030_v8 }
 0x319   :  { %v1154_v13 = vadd.f32 %v1153_v21, %v1152_v23  ;;  %v1155_v38 = vsel %vm1149_vm6, %v1136_v41, 0.0  ;;  %v1137_v51 = vsel %vm1121_vm8, %v1068_v48, 0.0  ;;  %v901_v16 = vmul.f32 0.6931472, %v1400_v42  ;;  %v1402_v27 = vpop.eup %1401 }
 0x31a   :  { %v867_v61 = vpop.xlane.xlu2 %866  ;;  %v1157_v62 = vsel %vm1149_vm6, %v1137_v51, 0.0  ;;  %v1070_v18 = vsub.f32 %v924_v29, %v2104_v25  ;;  %v1138_v24 = vsel %vm1122_vm9, %v1069_v10, 0.0  ;;  %v903_v8 = vmul.f32 0.6931472, %v1402_v27 }
 0x31b   :  { %1403 = vlog2.f32 %v867_v61  ;;  %v1156_v34 = vadd.f32 %v1155_v38, %v1154_v13  ;;  %v925_v43 = vadd.f32 %v901_v16, %v2028_v1  ;;  %vm1123_vm10 = vcmp.lt.s32.totalorder %v1087_v57, %v2123_v58 }
 0x31c   :  { %v1159_v60 = vsel %vm1149_vm6, %v1138_v24, 0.0  ;;  %v1139_v26 = vsel %vm1123_vm10, %v1070_v18, 0.0  ;;  %v926_v33 = vadd.f32 %v903_v8, %v2037_v53  ;;  %v1089_v1 = vadd.s32 64, %v2113_v56 }
 0x31d   :  { %v1158_v11 = vadd.f32 %v1157_v62, %v1156_v34  ;;  %v1071_v22 = vsub.f32 %v925_v43, %v2108_v6  ;;  %v1161_v4 = vsel %vm1149_vm6, %v1139_v26, 0.0  ;;  %v1093_v16 = vadd.s32 96, %v2113_v56 }
 0x31e   :  { %v1072_v63 = vsub.f32 %v926_v33, %v2106_v0  ;;  %vm1125_vm12 = vcmp.lt.s32.totalorder %v1089_v1, %v2123_v58  ;;  %v1094_v27 = vadd.s32 104, %v2113_v56  ;;  %v1095_v8 = vadd.s32 112, %v2113_v56 }
 0x31f   :  { %v1160_v25 = vadd.f32 %v1159_v60, %v1158_v11  ;;  %v1140_v39 = vsel %vm1124_vm11, %v1071_v22, 0.0  ;;  %vm1129_vm0 = vcmp.lt.s32.totalorder %v1093_v16, %v2123_v58 }
 0x320   :  { %v1163_v3 = vsel %vm1149_vm6, %v1140_v39, 0.0  ;;  %v1141_v50 = vsel %vm1125_vm12, %v1072_v63, 0.0  ;;  %vm1130_vm1 = vcmp.lt.s32.totalorder %v1094_v27, %v2123_v58  ;;  %vm1131_vm2 = vcmp.lt.s32.totalorder %v1095_v8, %v2123_v58 }
 0x321   :  { %v1404_v9 = vpop.eup %1403  ;;  %v1162_v6 = vadd.f32 %v1161_v4, %v1160_v25  ;;  %v1165_v48 = vsel %vm1149_vm6, %v1141_v50, 0.0  ;;  %v1096_v25 = vadd.s32 120, %v2113_v56 }
 0x322   :  { %v905_v55 = vmul.f32 0.6931472, %v1404_v9 }
 0x323   :  { %v1164_v35 = vadd.f32 %v1163_v3, %v1162_v6  ;;  %vm1132_vm3 = vcmp.lt.s32.totalorder %v1096_v25, %v2123_v58 }
 0x324   :  { %v927_v19 = vadd.f32 %v905_v55, %v2043_v14  ;;  %v1091_v14 = vadd.s32 80, %v2113_v56 }
 0x325   :  { %v1166_v29 = vadd.f32 %v1165_v48, %v1164_v35 }
 0x326   :  { %v1073_v53 = vsub.f32 %v927_v19, %v2110_v49  ;;  %vm1127_vm14 = vcmp.lt.s32.totalorder %v1091_v14, %v2123_v58 }
 0x328   :  { %v1142_v61 = vsel %vm1126_vm13, %v1073_v53, 0.0 }
 0x329   :  { %v1167_v38 = vsel %vm1149_vm6, %v1142_v61, 0.0 }
 0x32a   :  { %v1168_v57 = vadd.f32 %v1167_v38, %v1166_v29 }
 0x333   :  { %v870_v40 = vpop.xlane.xlu1 %869 }
 0x334   :  { %1405 = vlog2.f32 %v870_v40 }
 0x33a   :  { %v1406_v2 = vpop.eup %1405 }
 0x33b   :  { %v873_v46 = vpop.xlane.xlu0 %872  ;;  %v907_v54 = vmul.f32 0.6931472, %v1406_v2 }
 0x33c   :  { %1407 = vlog2.f32 %v873_v46 }
 0x33d   :  { %v928_v0 = vadd.f32 %v907_v54, %v2050_v17 }
 0x342   :  { %v1408_v44 = vpop.eup %1407 }
 0x343   :  { %v909_v7 = vmul.f32 0.6931472, %v1408_v44 }
 0x345   :  { %v929_v41 = vadd.f32 %v909_v7, %v2054_v15 }
 0x34e   :  { %v876_v37 = vpop.xlane.xlu2 %875 }
 0x34f   :  { %1409 = vlog2.f32 %v876_v37 }
 0x355   :  { %v1410_v31 = vpop.eup %1409 }
 0x356   :  { %v879_v47 = vpop.xlane.xlu1 %878  ;;  %v911_v10 = vmul.f32 0.6931472, %v1410_v31 }
 0x358   :  { %v930_v62 = vadd.f32 %v911_v10, %v2060_v20 }
 0x35e   :  { %v1051_v23 = vpop.xlane.xlu1 %1050 }
 0x35f   :  { %v1075_v17 = vsub.f32 %v929_v41, %v1051_v23 }
 0x361   :  { %v1144_v9 = vsel %vm1128_vm15, %v1075_v17, 0.0 }
 0x366   :  { %v1060_v5 = vpop.xlane.xlu1 %1059 }
 0x369   :  { %v882_v28 = vpop.xlane.xlu0 %881 }
 0x36a   :  { %1411 = vlog2.f32 %v882_v28 }
 0x36b   :  { %1413 = vlog2.f32 %v879_v47 }
 0x370   :  { %v1412_v21 = vpop.eup %1411 }
 0x371   :  { %v1414_v30 = vpop.eup %1413  ;;  %v885_v49 = vpop.xlane.xlu2 %884  ;;  %v915_v42 = vmul.f32 0.6931472, %v1412_v21 }
 0x372   :  { %v1048_v59 = vpop.xlane.xlu0 %1047  ;;  %1415 = vlog2.f32 %v885_v49  ;;  %v913_v40 = vmul.f32 0.6931472, %v1414_v30 }
 0x373   :  { %v1074_v13 = vsub.f32 %v928_v0, %v1048_v59  ;;  %v932_v15 = vadd.f32 %v915_v42, %v2073_v52  ;;  %v1171_v52 = vsel %vm1149_vm6, %v1144_v9, 0.0 }
 0x374   :  { %v931_v18 = vadd.f32 %v913_v40, %v2064_v45 }
 0x375   :  { %v1143_v51 = vsel %vm1127_vm14, %v1074_v13, 0.0  ;;  %v1078_v37 = vsub.f32 %v932_v15, %v1060_v5 }
 0x376   :  { %v1169_v34 = vsel %vm1149_vm6, %v1143_v51, 0.0 }
 0x377   :  { %v1170_v46 = vadd.f32 %v1169_v34, %v1168_v57  ;;  %v1147_v36 = vsel %vm1131_vm2, %v1078_v37, 0.0 }
 0x378   :  { %v1416_v24 = vpop.eup %1415  ;;  %v1177_v44 = vsel %vm1149_vm6, %v1147_v36, 0.0 }
 0x379   :  { %v1054_v11 = vpop.xlane.xlu2 %1053  ;;  %v917_v47 = vmul.f32 0.6931472, %v1416_v24  ;;  %v1172_v20 = vadd.f32 %v1171_v52, %v1170_v46 }
 0x37a   :  { %v1057_v43 = vpop.xlane.xlu0 %1056  ;;  %v1076_v55 = vsub.f32 %v930_v62, %v1054_v11 }
 0x37b   :  { %v1077_v60 = vsub.f32 %v931_v18, %v1057_v43  ;;  %v933_v2 = vadd.f32 %v917_v47, %v2081_v12 }
 0x37c   :  { %v1145_v26 = vsel %vm1129_vm0, %v1076_v55, 0.0 }
 0x37d   :  { %v1146_v22 = vsel %vm1130_vm1, %v1077_v60, 0.0  ;;  %v1173_v45 = vsel %vm1149_vm6, %v1145_v26, 0.0 }
 0x37e   :  { %v1174_v33 = vadd.f32 %v1173_v45, %v1172_v20  ;;  %v1175_v1 = vsel %vm1149_vm6, %v1146_v22, 0.0 }
 0x380   :  { %v1176_v19 = vadd.f32 %v1175_v1, %v1174_v33 }
 0x381   :  { %v1063_v28 = vpop.xlane.xlu2 %1062 }
 0x382   :  { %v1079_v4 = vsub.f32 %v933_v2, %v1063_v28  ;;  %v1178_v6 = vadd.f32 %v1177_v44, %v1176_v19 }
 0x384   :  { %v1148_v39 = vsel %vm1132_vm3, %v1079_v4, 0.0 }
 0x385   :  { %v1179_v63 = vsel %vm1149_vm6, %v1148_v39, 0.0 }
 0x386   :  { %v1180_v56 = vadd.f32 %v1179_v63, %v1178_v6 }
 0x388   :  { %1181 = vadd.xlane.f32.xlu0 %v1180_v56 }
 0x3fb   :  { %v1182_v53 = vpop.xlane.xlu0 %1181 }
 0x3fc   :  { %v1183_v54 = vrot.slane %v1182_v53, 4 }
 0x3fe   :  { %v1184_v14 = vadd.f32 %v1183_v54, %v1182_v53 }
 0x400   :  { %v1185_v3 = vrot.slane %v1184_v14, 2 }
 0x402   :  { %v1186_v7 = vadd.f32 %v1185_v3, %v1184_v14 }
 0x404   :  { %v1187_v31 = vrot.slane %v1186_v7, 1 }
 0x406   :  { %v1188_v12 = vadd.f32 %v1187_v31, %v1186_v7 }
 0x408   :  { %1248 = vpush %v1188_v12 }
 0x439   :  { %s1249_s0 = spop %1248 }
 0x43a   :  { %v1190_v35 = vstv %s1249_s0 }
 0x43b   :  { %1191 = vst [vmem:[%s2205_s8] sm:$0xff] %v1190_v35 }

</bundles_post_ra>
